<compile_context>
chip_gen: v7x
topology: tpu7x:2x2x1
jax: 0.10.0
libtpu: 0.0.40
codegen_flags: <defaults>
</compile_context>

<pallas_src>
import jax
import jax.numpy as jnp
import numpy as np
from jax import lax
from jax.experimental import pallas as pl
from jax.experimental.pallas import tpu as pltpu


# ----------------------------------------------------------------------------
# Kernel factory: fused bottom MLP + DMA embedding gather for one batch tile
# ----------------------------------------------------------------------------
def make_dlrm_bottom_kernel(num_layers: int, num_cat: int, emb_dim: int):
    C, D = num_cat, emb_dim

    def kernel(gids_ref,     # [B*C] int32 in SMEM (scalar-prefetched, offsets folded)
               num_ref,      # [TB, Npad]  numerical-feature tile (VMEM)
               *rest):
        layer_refs = rest[:2 * num_layers]          # (w [in,out], b [1,out]) per layer
        tab_hbm = rest[2 * num_layers]              # [R, D] fused table, resident in HBM
        bot_ref = rest[2 * num_layers + 1]          # [TB, (1+C)*D] output tile (VMEM)
        emb_buf = rest[2 * num_layers + 2]          # [TB, C*D] gather landing buffer (VMEM)
        sem = rest[2 * num_layers + 3]              # DMA completion semaphore

        tb = num_ref.shape[0]
        base = pl.program_id(0) * tb                # first batch row of this tile

        # ---- 1) issue every embedding-row gather (HBM -> VMEM) and let them fly
        def issue_row(r, carry):
            for c in range(C):                      # C is small & static -> unrolled
                gid = gids_ref[(base + r) * C + c]
                pltpu.make_async_copy(
                    tab_hbm.at[pl.ds(gid, 1), :],
                    emb_buf.at[pl.ds(r, 1), pl.ds(c * D, D)],
                    sem,
                ).start()
            return carry

        lax.fori_loop(0, tb, issue_row, 0)

        # ---- 2) bottom MLP (Linear + ReLU after every layer), overlapping the DMAs
        native_dt = num_ref.dtype
        h = num_ref[...]
        for layer in range(num_layers):
            w = layer_refs[2 * layer][...]
            b = layer_refs[2 * layer + 1][...]
            acc = jnp.dot(h, w, preferred_element_type=jnp.float32)
            acc = jnp.maximum(acc + b.astype(jnp.float32), 0.0)
            # keep bf16 operands bf16 between layers; final layer stays f32 until store
            h = acc.astype(native_dt) if layer + 1 < num_layers else acc

        # feature 0 of the fused output = bottom MLP output (lane-aligned slice store)
        bot_ref[:, pl.ds(0, D)] = h.astype(bot_ref.dtype)

        # ---- 3) wait for every gather, then one wide lane-aligned embedding store
        def wait_one(i, carry):
            # reconstructed descriptor of identical size -> decrements sem per copy
            pltpu.make_async_copy(
                tab_hbm.at[pl.ds(0, 1), :],
                emb_buf.at[pl.ds(0, 1), pl.ds(0, D)],
                sem,
            ).wait()
            return carry

        lax.fori_loop(0, tb * C, wait_one, 0)

        bot_ref[:, pl.ds(D, C * D)] = emb_buf[...].astype(bot_ref.dtype)

    return kernel


# ----------------------------------------------------------------------------
# Wrapper
# ----------------------------------------------------------------------------
def dlrm_bottom_pallas(numerical_input, categorical_inputs,
                       mlp_weights, mlp_biases, emb_table, emb_offsets,
                       *, tb=256):
    """mlp_weights[i]: [in, out] (pre-transposed), mlp_biases[i]: [1, out],
    emb_table: [sum(sizes), D] fused table, emb_offsets: [C] int32 row offsets."""
    B, n_num = numerical_input.shape
    _, C = categorical_inputs.shape
    R, D = emb_table.shape
    F = 1 + C
    num_layers = len(mlp_weights)
    out_dtype = numerical_input.dtype

    tb = min(tb, B)
    assert B % tb == 0, "batch size must be divisible by the batch tile"
    assert int(mlp_weights[-1].shape[1]) == D, \
        "The last bottom MLP layer must have same size as embedding."
    assert emb_table.dtype == out_dtype, "embedding table dtype must match activations"

    # zero-pad the numerical-feature dim (and first weight's rows) to 128 lanes
    n_pad = ((n_num + 127) // 128) * 128
    if n_pad != n_num:
        numerical_input = jnp.pad(numerical_input, ((0, 0), (0, n_pad - n_num)))
        mlp_weights = ([jnp.pad(mlp_weights[0], ((0, n_pad - n_num), (0, 0)))]
                       + list(mlp_weights[1:]))

    # fold per-table row offsets into the ids host-side; flatten row-major [B*C]
    gids = (categorical_inputs.astype(jnp.int32)
            + emb_offsets.astype(jnp.int32)[None, :]).reshape(-1)

    in_specs = [pl.BlockSpec((tb, n_pad), lambda i, ids: (i, 0))]   # numerical tile
    flat_wb = []
    for w, b in zip(mlp_weights, mlp_biases):
        in_specs.append(pl.BlockSpec(w.shape, lambda i, ids: (0, 0)))   # grid-invariant
        in_specs.append(pl.BlockSpec(b.shape, lambda i, ids: (0, 0)))
        flat_wb += [w, b]
    in_specs.append(pl.BlockSpec(memory_space=pl.ANY))              # table stays in HBM

    out_specs = pl.BlockSpec((tb, F * D), lambda i, ids: (i, 0))    # lane-dense output
    out_shape = jax.ShapeDtypeStruct((B, F * D), out_dtype)

    itemsize = numerical_input.dtype.itemsize
    mlp_flops = 2 * B * sum(int(w.shape[0]) * int(w.shape[1]) for w in mlp_weights)
    bytes_accessed = int(
        itemsize * (numerical_input.size + B * F * D + B * C * D
                    + sum(int(w.size) + int(b.size)
                          for w, b in zip(mlp_weights, mlp_biases)))
        + 4 * gids.size)

    bot2d = pl.pallas_call(
        make_dlrm_bottom_kernel(num_layers, C, D),
        out_shape=out_shape,
        grid_spec=pltpu.PrefetchScalarGridSpec(
            num_scalar_prefetch=1,
            grid=(B // tb,),
            in_specs=in_specs,
            out_specs=out_specs,
            scratch_shapes=[pltpu.VMEM((tb, C * D), emb_table.dtype),
                            pltpu.SemaphoreType.DMA]),
        compiler_params=pltpu.CompilerParams(
            dimension_semantics=("parallel",),           # both v7x TCs split the batch
            vmem_limit_bytes=48 * 1024 * 1024),
        cost_estimate=pl.CostEstimate(flops=int(mlp_flops),
                                      transcendentals=0,
                                      bytes_accessed=bytes_accessed),
    )(gids, numerical_input, *flat_wb, emb_table)

    # bottom_mlp_output is exactly column block 0 of the fused lane-dense output
    return bot2d.reshape(B, F, D), bot2d[:, :D]


# ----------------------------------------------------------------------------
# Parameter construction (mirrors the PyTorch module's shapes & init style)
# ----------------------------------------------------------------------------
def make_params(key, n_num, cat_sizes, mlp_sizes, emb_dim, dtype=jnp.float32):
    assert mlp_sizes[-1] == emb_dim, \
        "The last bottom MLP layer must have same size as embedding."
    keys = jax.random.split(key, 2 * len(mlp_sizes) + len(cat_sizes))
    ki = iter(keys)

    # bottom MLP weights in PyTorch nn.Linear layout [out, in]
    torch_w, torch_b = [], []
    in_dim = n_num
    for out_dim in mlp_sizes:
        bound = 1.0 / float(np.sqrt(in_dim))
        torch_w.append(jax.random.uniform(next(ki), (out_dim, in_dim), dtype, -bound, bound))
        torch_b.append(jax.random.uniform(next(ki), (out_dim,), dtype, -bound, bound))
        in_dim = out_dim

    # embedding tables, uniform(-sqrt(1/size), sqrt(1/size)) like the module
    tables = []
    for size in cat_sizes:
        bound = float(np.sqrt(1.0 / size))
        tables.append(jax.random.uniform(next(ki), (size, emb_dim), dtype, -bound, bound))

    # kernel-side repacking (host, once)
    k_w = [jnp.transpose(w) for w in torch_w]             # [in, out]
    k_b = [b.reshape(1, -1) for b in torch_b]             # [1, out]
    offsets = np.concatenate([[0], np.cumsum(np.asarray(cat_sizes))[:-1]]).astype(np.int32)
    fused = jnp.concatenate(tables, axis=0)               # [sum(sizes), D], stays in HBM

    kernel_params = (k_w, k_b, fused, jnp.asarray(offsets, jnp.int32))
    torch_like_params = (torch_w, torch_b, tables)
    return kernel_params, torch_like_params


# ----------------------------------------------------------------------------
# Pure-JAX reference (mirrors the PyTorch forward exactly)
# ----------------------------------------------------------------------------
def dlrm_bottom_reference(numerical, categorical, torch_params):
    torch_w, torch_b, tables = torch_params
    h = numerical
    for w, b in zip(torch_w, torch_b):
        h = jax.nn.relu(jnp.dot(h, w.T, precision="highest") + b)   # ReLU after every layer
    pieces = [h[:, None, :]]
    for c, tab in enumerate(tables):
        pieces.append(tab[categorical[:, c]][:, None, :])
    return jnp.concatenate(pieces, axis=1), h


# ----------------------------------------------------------------------------
if __name__ == "__main__":
    B = 512                      # 2 batch tiles of 256 -> both v7x TensorCores busy
    N_NUM = 13                   # num_numerical_features (DLRM default), padded to 128
    CAT_SIZES = (100, 57, 31)    # small categorical_feature_sizes
    MLP_SIZES = (256, 128)       # bottom_mlp_sizes (last == embedding_dim)
    EMB_DIM = 128                # lane-dense embedding dim (production DLRM value)

    key = jax.random.PRNGKey(0)
    k_num, k_cat, k_par = jax.random.split(key, 3)

    numerical = jax.random.normal(k_num, (B, N_NUM), jnp.float32)
    cat_cols = [jax.random.randint(jax.random.fold_in(k_cat, c), (B, 1), 0, size, jnp.int32)
                for c, size in enumerate(CAT_SIZES)]
    categorical = jnp.concatenate(cat_cols, axis=1)

    (k_w, k_b, emb_table, emb_offsets), torch_params = make_params(
        k_par, N_NUM, CAT_SIZES, MLP_SIZES, EMB_DIM)

    bot, bmlp = dlrm_bottom_pallas(numerical, categorical, k_w, k_b,
                                   emb_table, emb_offsets, tb=256)
    bot = jax.block_until_ready(bot)
    bmlp = jax.block_until_ready(bmlp)

    ref_bot, ref_bmlp = dlrm_bottom_reference(numerical, categorical, torch_params)
    assert bot.shape == (B, 1 + len(CAT_SIZES), EMB_DIM)
    assert bmlp.shape == (B, EMB_DIM)
    assert jnp.allclose(bot, ref_bot, atol=5e-4, rtol=5e-4), (
        f"bottom_output max abs err {float(jnp.max(jnp.abs(bot - ref_bot)))}")
    assert jnp.allclose(bmlp, ref_bmlp, atol=5e-4, rtol=5e-4), (
        f"bottom_mlp_output max abs err {float(jnp.max(jnp.abs(bmlp - ref_bmlp)))}")

    print("KERNEL_OK")
</pallas_src>

<mosaic_0001>
module attributes {stable_mosaic.version = 11 : i64} {
  func.func @kernel(%arg0: i32, %arg1: memref<1536xi32, #tpu.memory_space<smem>>, %arg2: memref<256x128xf32, #tpu.memory_space<vmem>>, %arg3: memref<128x256xf32, #tpu.memory_space<vmem>>, %arg4: memref<1x256xf32, #tpu.memory_space<vmem>>, %arg5: memref<256x128xf32, #tpu.memory_space<vmem>>, %arg6: memref<1x128xf32, #tpu.memory_space<vmem>>, %arg7: memref<188x128xf32, #tpu.memory_space<any>>, %arg8: memref<256x512xf32, #tpu.memory_space<vmem>>, %arg9: memref<256x384xf32, #tpu.memory_space<vmem>>, %arg10: memref<!tpu.dma_semaphore, #tpu.memory_space<semaphore_mem>>) attributes {dimension_semantics = [#tpu.dimension_semantics<parallel>], iteration_bounds = array<i64: 2>, scalar_prefetch = 1 : i64, scratch_operands = 2 : i64, tpu.core_type = #tpu.core_type<tc>, window_params = [{transform_indices = @transform_0, window_bounds = array<i64: 256, 128>}, {pipeline_mode = #tpu.pipeline_mode<synchronous>, transform_indices = @transform_1, window_bounds = array<i64: 128, 256>}, {pipeline_mode = #tpu.pipeline_mode<synchronous>, transform_indices = @transform_2, window_bounds = array<i64: 1, 256>}, {pipeline_mode = #tpu.pipeline_mode<synchronous>, transform_indices = @transform_3, window_bounds = array<i64: 256, 128>}, {pipeline_mode = #tpu.pipeline_mode<synchronous>, transform_indices = @transform_4, window_bounds = array<i64: 1, 128>}, {}, {transform_indices = @transform_6, window_bounds = array<i64: 256, 512>}]} {
    %c256_i32 = arith.constant 256 : i32
    %0 = arith.muli %arg0, %c256_i32 : i32
    %c0_i32 = arith.constant 0 : i32
    %c256_i32_0 = arith.constant 256 : i32
    %1 = arith.addi %c0_i32, %c256_i32_0 : i32
    %c1_i32 = arith.constant 1 : i32
    scf.for %arg11 = %c0_i32 to %1 step %c1_i32  : i32 {
      %21 = arith.addi %0, %arg11 : i32
      %c3_i32 = arith.constant 3 : i32
      %22 = arith.muli %21, %c3_i32 : i32
      %c0_i32_21 = arith.constant 0 : i32
      %23 = arith.addi %22, %c0_i32_21 : i32
      %24 = arith.index_cast %23 : i32 to index
      %25 = memref.load %arg1[%24] : memref<1536xi32, #tpu.memory_space<smem>>
      %c0_i32_22 = arith.constant 0 : i32
      %26 = tpu.memref_slice %arg7[%25, %c0_i32_22] : memref<188x128xf32, #tpu.memory_space<any>> -> memref<1x128xf32, #tpu.memory_space<any>>
      %c0_i32_23 = arith.constant 0 : i32
      %27 = tpu.memref_slice %arg9[%arg11, %c0_i32_23] : memref<256x384xf32, #tpu.memory_space<vmem>> -> memref<1x128xf32, #tpu.memory_space<vmem>>
      tpu.enqueue_dma source(%26 : memref<1x128xf32, #tpu.memory_space<any>>) target(%27 : memref<1x128xf32, #tpu.memory_space<vmem>>) target_semaphore(%arg10 : memref<!tpu.dma_semaphore, #tpu.memory_space<semaphore_mem>>)
      %28 = arith.addi %0, %arg11 : i32
      %c3_i32_24 = arith.constant 3 : i32
      %29 = arith.muli %28, %c3_i32_24 : i32
      %c1_i32_25 = arith.constant 1 : i32
      %30 = arith.addi %29, %c1_i32_25 : i32
      %31 = arith.index_cast %30 : i32 to index
      %32 = memref.load %arg1[%31] : memref<1536xi32, #tpu.memory_space<smem>>
      %c0_i32_26 = arith.constant 0 : i32
      %33 = tpu.memref_slice %arg7[%32, %c0_i32_26] : memref<188x128xf32, #tpu.memory_space<any>> -> memref<1x128xf32, #tpu.memory_space<any>>
      %c128_i32 = arith.constant 128 : i32
      %34 = tpu.memref_slice %arg9[%arg11, %c128_i32] : memref<256x384xf32, #tpu.memory_space<vmem>> -> memref<1x128xf32, #tpu.memory_space<vmem>>
      tpu.enqueue_dma source(%33 : memref<1x128xf32, #tpu.memory_space<any>>) target(%34 : memref<1x128xf32, #tpu.memory_space<vmem>>) target_semaphore(%arg10 : memref<!tpu.dma_semaphore, #tpu.memory_space<semaphore_mem>>)
      %35 = arith.addi %0, %arg11 : i32
      %c3_i32_27 = arith.constant 3 : i32
      %36 = arith.muli %35, %c3_i32_27 : i32
      %c2_i32 = arith.constant 2 : i32
      %37 = arith.addi %36, %c2_i32 : i32
      %38 = arith.index_cast %37 : i32 to index
      %39 = memref.load %arg1[%38] : memref<1536xi32, #tpu.memory_space<smem>>
      %c0_i32_28 = arith.constant 0 : i32
      %40 = tpu.memref_slice %arg7[%39, %c0_i32_28] : memref<188x128xf32, #tpu.memory_space<any>> -> memref<1x128xf32, #tpu.memory_space<any>>
      %c256_i32_29 = arith.constant 256 : i32
      %41 = tpu.memref_slice %arg9[%arg11, %c256_i32_29] : memref<256x384xf32, #tpu.memory_space<vmem>> -> memref<1x128xf32, #tpu.memory_space<vmem>>
      tpu.enqueue_dma source(%40 : memref<1x128xf32, #tpu.memory_space<any>>) target(%41 : memref<1x128xf32, #tpu.memory_space<vmem>>) target_semaphore(%arg10 : memref<!tpu.dma_semaphore, #tpu.memory_space<semaphore_mem>>)
    }
    %c256_i32_1 = arith.constant 256 : i32
    %c0 = arith.constant 0 : index
    %c0_2 = arith.constant 0 : index
    %2 = vector.load %arg2[%c0, %c0_2] : memref<256x128xf32, #tpu.memory_space<vmem>>, vector<256x128xf32>
    %c0_3 = arith.constant 0 : index
    %c0_4 = arith.constant 0 : index
    %3 = vector.load %arg3[%c0_3, %c0_4] : memref<128x256xf32, #tpu.memory_space<vmem>>, vector<128x256xf32>
    %c0_5 = arith.constant 0 : index
    %c0_6 = arith.constant 0 : index
    %4 = vector.load %arg4[%c0_5, %c0_6] : memref<1x256xf32, #tpu.memory_space<vmem>>, vector<1x256xf32>
    %cst = arith.constant dense<0.000000e+00> : vector<256x256xf32>
    %5 = tpu.matmul %2, %3, %cst {dimension_numbers = #tpu.dot_dimension_numbers<[1], [0], [0], [1], [0, 0, 1, 1], [], []>} : vector<256x128xf32>, vector<128x256xf32>, vector<256x256xf32> -> vector<256x256xf32>
    %6 = vector.broadcast %4 : vector<1x256xf32> to vector<256x256xf32>
    %7 = arith.addf %5, %6 : vector<256x256xf32>
    %cst_7 = arith.constant 0.000000e+00 : f32
    %8 = vector.broadcast %cst_7 : f32 to vector<256x256xf32>
    %9 = arith.maximumf %7, %8 : vector<256x256xf32>
    %c0_8 = arith.constant 0 : index
    %c0_9 = arith.constant 0 : index
    %10 = vector.load %arg5[%c0_8, %c0_9] : memref<256x128xf32, #tpu.memory_space<vmem>>, vector<256x128xf32>
    %c0_10 = arith.constant 0 : index
    %c0_11 = arith.constant 0 : index
    %11 = vector.load %arg6[%c0_10, %c0_11] : memref<1x128xf32, #tpu.memory_space<vmem>>, vector<1x128xf32>
    %cst_12 = arith.constant dense<0.000000e+00> : vector<256x128xf32>
    %12 = tpu.matmul %9, %10, %cst_12 {dimension_numbers = #tpu.dot_dimension_numbers<[1], [0], [0], [1], [0, 0, 1, 1], [], []>} : vector<256x256xf32>, vector<256x128xf32>, vector<256x128xf32> -> vector<256x128xf32>
    %13 = vector.broadcast %11 : vector<1x128xf32> to vector<256x128xf32>
    %14 = arith.addf %12, %13 : vector<256x128xf32>
    %cst_13 = arith.constant 0.000000e+00 : f32
    %15 = vector.broadcast %cst_13 : f32 to vector<256x128xf32>
    %16 = arith.maximumf %14, %15 : vector<256x128xf32>
    %c0_14 = arith.constant 0 : index
    %c0_15 = arith.constant 0 : index
    %17 = vector.load %arg8[%c0_14, %c0_15] : memref<256x512xf32, #tpu.memory_space<vmem>>, vector<256x128xf32>
    tpu.vector_store %arg8[%c0_14, %c0_15], %16 {strides = array<i32>} : memref<256x512xf32, #tpu.memory_space<vmem>>, vector<256x128xf32>,
    %c0_i32_16 = arith.constant 0 : i32
    %c768_i32 = arith.constant 768 : i32
    %18 = arith.addi %c0_i32_16, %c768_i32 : i32
    %c1_i32_17 = arith.constant 1 : i32
    scf.for %arg11 = %c0_i32_16 to %18 step %c1_i32_17  : i32 {
      %c0_i32_21 = arith.constant 0 : i32
      %c0_i32_22 = arith.constant 0 : i32
      %21 = tpu.memref_slice %arg7[%c0_i32_21, %c0_i32_22] : memref<188x128xf32, #tpu.memory_space<any>> -> memref<1x128xf32, #tpu.memory_space<any>>
      %c0_i32_23 = arith.constant 0 : i32
      %c0_i32_24 = arith.constant 0 : i32
      %22 = tpu.memref_slice %arg9[%c0_i32_23, %c0_i32_24] : memref<256x384xf32, #tpu.memory_space<vmem>> -> memref<1x128xf32, #tpu.memory_space<vmem>>
      tpu.wait_dma2 semaphore(%arg10 : memref<!tpu.dma_semaphore, #tpu.memory_space<semaphore_mem>>) src(%21 : memref<1x128xf32, #tpu.memory_space<any>>) dst(%22 : memref<1x128xf32, #tpu.memory_space<vmem>>)
    }
    %c0_18 = arith.constant 0 : index
    %c0_19 = arith.constant 0 : index
    %19 = vector.load %arg9[%c0_18, %c0_19] : memref<256x384xf32, #tpu.memory_space<vmem>>, vector<256x384xf32>
    %c0_20 = arith.constant 0 : index
    %c128 = arith.constant 128 : index
    %20 = vector.load %arg8[%c0_20, %c128] : memref<256x512xf32, #tpu.memory_space<vmem>>, vector<256x384xf32>
    tpu.vector_store %arg8[%c0_20, %c128], %19 {strides = array<i32>} : memref<256x512xf32, #tpu.memory_space<vmem>>, vector<256x384xf32>,
    return
  }
  func.func @transform_0(%arg0: i32, %arg1: memref<1536xi32, #tpu.memory_space<smem>>) -> (i32, i32) {
    %c0_i32 = arith.constant 0 : i32
    %c0_i32_0 = arith.constant 0 : i32
    return %arg0, %c0_i32 : i32, i32
  }
  func.func @transform_1(%arg0: i32, %arg1: memref<1536xi32, #tpu.memory_space<smem>>) -> (i32, i32) {
    %c0_i32 = arith.constant 0 : i32
    %c0_i32_0 = arith.constant 0 : i32
    %c0_i32_1 = arith.constant 0 : i32
    return %c0_i32, %c0_i32_0 : i32, i32
  }
  func.func @transform_2(%arg0: i32, %arg1: memref<1536xi32, #tpu.memory_space<smem>>) -> (i32, i32) {
    %c0_i32 = arith.constant 0 : i32
    %c0_i32_0 = arith.constant 0 : i32
    %c0_i32_1 = arith.constant 0 : i32
    return %c0_i32, %c0_i32_0 : i32, i32
  }
  func.func @transform_3(%arg0: i32, %arg1: memref<1536xi32, #tpu.memory_space<smem>>) -> (i32, i32) {
    %c0_i32 = arith.constant 0 : i32
    %c0_i32_0 = arith.constant 0 : i32
    %c0_i32_1 = arith.constant 0 : i32
    return %c0_i32, %c0_i32_0 : i32, i32
  }
  func.func @transform_4(%arg0: i32, %arg1: memref<1536xi32, #tpu.memory_space<smem>>) -> (i32, i32) {
    %c0_i32 = arith.constant 0 : i32
    %c0_i32_0 = arith.constant 0 : i32
    %c0_i32_1 = arith.constant 0 : i32
    return %c0_i32, %c0_i32_0 : i32, i32
  }
  func.func @transform_6(%arg0: i32, %arg1: memref<1536xi32, #tpu.memory_space<smem>>) -> (i32, i32) {
    %c0_i32 = arith.constant 0 : i32
    %c0_i32_0 = arith.constant 0 : i32
    return %arg0, %c0_i32 : i32, i32
  }
}

</mosaic_0001>

<bundles_post_ra>
// kernel: tpu_custom_call.1
= control target key start
LH: loop header
LB: loop body
LE: loop exit
PB: predicated region body
PF: predicated region fallthrough
CT: control target
= control target key end

     0   :  { %s2621_s0 = inlined_call_operand.hbm [shape: s32[1536], index: 0, kind: input, shape index: {}]   ;;  %s2622_s1 = inlined_call_operand.hbm [shape: f32[512,128], index: 1, kind: input, shape index: {}]   ;;  %s2623_s2 = inlined_call_operand.hbm [shape: f32[128,256], index: 2, kind: input, shape index: {}]   ;;  %s2624_s3 = inlined_call_operand.vmem [shape: f32[1,256], index: 3, kind: input, shape index: {}]   ;;  %s2625_s4 = inlined_call_operand.hbm [shape: f32[256,128], index: 4, kind: input, shape index: {}]   ;;  %s2626_s5 = inlined_call_operand.vmem [shape: f32[1,128], index: 5, kind: input, shape index: {}]   ;;  %s2627_s6 = inlined_call_operand.hbm [shape: f32[188,128], index: 6, kind: input, shape index: {}]   ;;  %s2628_s7 = inlined_call_operand.hbm [shape: f32[512,512], index: 7, kind: output, shape index: {}]  }
   0x1   :  { %2637 = sst [smem:[#allocation31_spill]] %s2622_s1  ;;  %s1640_s26 = scalar_lea.hbm %s2621_s0, 192 }
   0x2   :  { %2638 = sst [smem:[#allocation32_spill]] %s2623_s2  ;;  %p1641_p0 = scmp.ne.s32.totalorder %s2621_s0, %s1640_s26 }
   0x3   :  { %2639 = sst [smem:[#allocation33_spill]] %s2625_s4  ;;  %s1642_s8 = scalar_lea.hbm %s2621_s0, 256 }
   0x4   :  { %p1643_p1 = scmp.lt.u32.totalorder %s1642_s8, %s1640_s26  ;;  %p1644_p2 = scmp.lt.u32.totalorder %s1640_s26, %s2621_s0 }
   0x6   :  { %p1645_p3 = por %p1644_p2, %p1643_p1 }
   0x8   :  { %p1646_p4 = pnand %p1645_p3, %p1641_p0 }
   0xa   :  { %1649 = shalt.err (!%p1646_p4)  }
   0xb   :  { %s1900_s11 = smov [#allocation5]  }
   0xc   :  { %13 = dma.hbm_to_smem %s2621_s0, 192, %s1900_s11, [#allocation4] }
   0xd   :  { %1860 = dma.done.wait [#allocation4], 192 }
   0xe   :  { %1861 = vsyncadd [#allocation4], 4294967104 }
   0xf   :  { %15 = sfence }
  0x10   :  { %16 = vsyncpa [#allocation7], 0 }
  0x11   :  { %18 = vsyncpa [#allocation7 + $0x1], 0 }
  0x12   :  { %19 = vsyncpa [#allocation10], 0 }
  0x13   :  { %20 = vsyncpa [#allocation8], 0 }
  0x14   :  { %22 = vsyncpa [#allocation8 + $0x1], 0  ;;  %s1969_s14 = smov 0   ;;  %s1971_s15 = smov 0  }
  0x15   :  { %s1973_s16 = smov 0   ;;  %s1975_s17 = smov 0  }
  0x16 LB: > { %2640 = sst [smem:[#allocation26_spill]] %s1882_s15  ;;  %s1990_s0 = sadd.s32 4294967295, %s1890_s17   ;;  %s1890_s17 = sphi %s1975_s17, %s2663_s17   ;;  %s1886_s16 = sphi %s1973_s16, %s2666_s16   ;;  %s1882_s15 = sphi %s1971_s15, %s2665_s15   ;;  %s1878_s14 = sphi %s1969_s14, %s2664_s14  }
  0x17   : > { %2641 = sst [smem:[#allocation27_spill]] %s1886_s16  ;;  %s1408_s18 = sadd.s32 4294967294, %s1890_s17  }
  0x18   : > { %2642 = sst [smem:[#allocation28_spill]] %s1890_s17  ;;  %p48_p5 = scmp.ne.s32.totalorder %s1882_s15, %s1878_s14 }
  0x19   : > { %p2629_p6 = scmp.eq.s32.totalorder %s1990_s0, 0  ;;  %p162_p8 = scmp.eq.s32.totalorder %s1408_s18, 1 }
  0x1a   : > { %p1409_p10 = scmp.ge.s32.totalorder %s1890_s17, 1  ;;  %p169_p12 = scmp.lt.s32.totalorder %s1890_s17, 3 }
  0x1b   : > { %p1999_p9 = por %p2629_p6, %p48_p5  ;;  %p2004_p11 = por %p162_p8, %p48_p5 }
  0x1c   : > { %p2009_p13 = pnand %p1409_p10, %p169_p12  ;;  %s1901_s22 = smov [#allocation9]  }
  0x1d   : > { %s2643_s19 = scalar_select %p1999_p9, 1, 0 }
  0x1e   : > { %s2644_s20 = scalar_select %p2004_p11, 1, 0 }
  0x1f   : > { %s181_s23 = sshll.u32 %s1901_s22, 4  ;;  %p1560_p0 = pneg %p2009_p13  ;;  %s2013_s23 = int_to_ptr.vmem [resolvable:$true] %s181_s23 }
  0x20   : > { %s1902_s25 = smov [#allocation11]   ;;  %s2647_s2 = sld [smem:[#allocation32_spill]] }
  0x21   : > { %p2020_p2 = pnand %p1560_p0, %p2629_p6  ;;  %s197_s26 = sshll.u32 %s1902_s25, 4  ;;  %s2024_s26 = int_to_ptr.vmem [resolvable:$true] %s197_s26 }
  0x23   : > { %p1652_p4 = pneg %p2020_p2 }
  0x26   : > { %s1650_s29 = scalar_lea.hbm %s2647_s2, 4096 }
  0x27   : > { %p1651_p3 = scmp.ne.s32.totalorder %s2647_s2, %s1650_s29  ;;  %p1657_p10 = scmp.lt.u32.totalorder %s1650_s29, %s2647_s2 }
  0x29   : > { %p1653_p5 = pnand %p1652_p4, %p1651_p3 }
  0x2b   : > { %p1654_p8 = pneg %p1653_p5 }
  0x2d   : > { %p1659_p12 = pnand %p1657_p10, %p1654_p8 }
  0x2f   : > { %1662 = shalt.err (!%p1659_p12)
}
  0x30   : > { %s1663_s11 = scalar_lea.vmem %s2013_s23, 4096  ;;  %p1671_p7 = scmp.lt.s32.totalorder %s2013_s23, %s2013_s23 }
  0x31   : > { %p1664_p0 = scmp.ne.s32.totalorder %s2013_s23, %s1663_s11  ;;  %p1672_p3 = scmp.lt.s32.totalorder %s1663_s11, %s1663_s11 }
  0x33   : > { %p1666_p1 = pnand %p1664_p0, %p1652_p4  ;;  %p1673_p5 = por %p1672_p3, %p1671_p7 }
  0x35   : > { %p1667_p6 = pneg %p1666_p1 }
  0x37   : > { %p1674_p11 = pnand %p1673_p5, %p1667_p6 }
  0x39   : > { %1677 = shalt.err (!%p1674_p11)
}
  0x3a   : > { %s1903_s12 = smov 256   ;;  %s1904_s13 = smov 16  }
  0x3b   : > { %1563 = dma.hbm_to_vmem [thread:$0]  (!%p2020_p2), %s2647_s2, 4096, %s2013_s23, [#allocation10], %s1903_s12, %s1903_s12, %s1904_s13  }
  0x3c   : > { %s2648_s4 = sld [smem:[#allocation33_spill]] }
  0x42   : > { %s1678_s28 = scalar_lea.hbm %s2648_s4, 4096 }
  0x43   : > { %p1679_p7 = scmp.ne.s32.totalorder %s2648_s4, %s1678_s28  ;;  %p1685_p1 = scmp.lt.u32.totalorder %s1678_s28, %s2648_s4 }
  0x45   : > { %p1681_p6 = pnand %p1679_p7, %p1652_p4 }
  0x47   : > { %p1682_p11 = pneg %p1681_p6 }
  0x49   : > { %p1687_p8 = pnand %p1685_p1, %p1682_p11 }
  0x4b   : > { %1690 = shalt.err (!%p1687_p8)
}
  0x4c   : > { %s1691_s23 = scalar_lea.vmem %s2024_s26, 4096  ;;  %p1699_p3 = scmp.lt.s32.totalorder %s2024_s26, %s2024_s26 }
  0x4d   : > { %p1692_p10 = scmp.ne.s32.totalorder %s2024_s26, %s1691_s23  ;;  %p1700_p5 = scmp.lt.s32.totalorder %s1691_s23, %s1691_s23 }
  0x4f   : > { %p1694_p12 = pnand %p1692_p10, %p1652_p4  ;;  %p1701_p7 = por %p1700_p5, %p1699_p3 }
  0x51   : > { %p1695_p0 = pneg %p1694_p12 }
  0x53   : > { %p1702_p6 = pnand %p1701_p7, %p1695_p0 }
  0x55   : > { %1705 = shalt.err (!%p1702_p6)
}
  0x56   : > { %s1905_s10 = smov 128   ;;  %s1906_s11 = smov 8  }
  0x57   : > { %1566 = dma.hbm_to_vmem [thread:$0]  (!%p2020_p2), %s2648_s4, 4096, %s2024_s26, [#allocation10], %s1905_s10, %s1905_s10, %s1906_s11  }
  0x58   : > { %s2082_s18 = sadd.s32 1, %s1890_s17   ;;  %s35_s25 = sadd.s32 1, %s1886_s16 }
  0x59   : > { %2649 = sst [smem:[#allocation29_spill]] %s2082_s18  ;;  %s32_s22 = ssub.s32 %s1890_s17, %s2082_s18 }
  0x5a   : > { %p33_p4 = scmp.eq.s32.totalorder %s32_s22, 0  ;;  %p42_p11 = scmp.ne.s32.totalorder %s1886_s16, %s1882_s15 }
  0x5b   : > { %p43_p1 = scmp.eq.s32.totalorder %s1890_s17, 0  ;;  %p2651_p10 = scmp.eq.s32.totalorder %s1990_s0, 1 }
  0x5c   : > { %s2091_s27 = scalar_select %p33_p4, %s1886_s16, %s35_s25  }
  0x5d   : > { %p44_p8 = por %p43_p1, %p42_p11  ;;  %p2095_p12 = por %p2651_p10, %p42_p11 }
  0x5e   : > { %2650 = sst [smem:[#allocation30_spill]] %s2091_s27  ;;  %p1577_p0 = scmp.lt.s32.totalorder %s1890_s17, 2 }
  0x5f   : > { %s2652_s24 = scalar_select %p2095_p12, 1, 0 }
  0x60   : > { %s214_s28 = sand.u32 1, %s1886_s16   ;;  %s1433_s26 = sshll.u32 %s1890_s17, 12 }
  0x61   : > { %s1413_s29 = sshll.u32 %s214_s28, 8  ;;  %s2653_s1 = sld [smem:[#allocation31_spill]] }
  0x62   : > { %s218_s23 = scalar_lea.vmem [#allocation6], %s1413_s29  ;;  %p2109_p2 = pnand %p1577_p0, %p44_p8 }
  0x63   : > { %s225_s12 = sshll.u32 %s218_s23, 4  ;;  %s2113_s22 = scalar_lea.sflag [#allocation7], %s214_s28  ;;  %s2107_s12 = int_to_ptr.vmem [resolvable:$true] %s225_s12 }
  0x64   : > { %p1708_p5 = pneg %p2109_p2 }
  0x67   : > { %s2105_s9 = scalar_lea.hbm %s2653_s1, %s1433_s26  ;;  %s1711_s30 = scalar_lea.hbm %s2653_s1, 8192 }
  0x68   : > { %s1706_s25 = scalar_lea.hbm %s2105_s9, 4096  ;;  %p1712_p4 = scmp.lt.u32.totalorder %s2105_s9, %s2653_s1 }
  0x69   : > { %p1707_p3 = scmp.ne.s32.totalorder %s2105_s9, %s1706_s25  ;;  %p1713_p11 = scmp.lt.u32.totalorder %s1711_s30, %s1706_s25 }
  0x6a   : > { %p1715_p8 = scmp.lt.u32.totalorder %s1706_s25, %s2105_s9 }
  0x6b   : > { %p1709_p7 = pnand %p1708_p5, %p1707_p3  ;;  %p1714_p1 = por %p1713_p11, %p1712_p4 }
  0x6d   : > { %p1710_p6 = pneg %p1709_p7  ;;  %p1716_p10 = por %p1715_p8, %p1714_p1 }
  0x6f   : > { %p1717_p0 = pnand %p1716_p10, %p1710_p6 }
  0x71   : > { %1720 = shalt.err (!%p1717_p0)
}
  0x72   : > { %s1721_s28 = scalar_lea.vmem %s2107_s12, 4096  ;;  %s1907_s29 = smov [#allocation6]  }
  0x73   : > { %p1722_p3 = scmp.ne.s32.totalorder %s2107_s12, %s1721_s28  ;;  %s1726_s26 = sshll.u32 %s1907_s29, 4  ;;  %s1727_s26 = int_to_ptr.vmem [resolvable:$false] %s1726_s26 }
  0x74   : > { %s1728_s8 = scalar_lea.vmem %s1727_s26, 8192  ;;  %p1729_p9 = scmp.lt.s32.totalorder %s2107_s12, %s1727_s26 }
  0x75   : > { %p1724_p7 = pnand %p1722_p3, %p1708_p5  ;;  %p1730_p4 = scmp.lt.s32.totalorder %s1728_s8, %s1721_s28 }
  0x77   : > { %p1725_p12 = pneg %p1724_p7  ;;  %p1731_p11 = por %p1730_p4, %p1729_p9 }
  0x79   : > { %p1732_p1 = pnand %p1731_p11, %p1725_p12 }
  0x7b   : > { %1735 = shalt.err (!%p1732_p1)
}
  0x7c   : > { %1570 = dma.hbm_to_vmem [thread:$0]  (!%p2109_p2), %s2105_s9, 4096, %s2107_s12, %s2113_s22, %s1905_s10, %s1905_s10, %s1906_s11  }
  0x7d   : > { %237 = sbr.rel (%p2009_p13) target bundleno = 874 (0x36a), region = 40  ;;  %s2147_s25 = sand.u32 (!%p2009_p13), 1, %s1882_s15  }
  0x7e   : > { %s1417_s30 = sshll.u32 (!%p2009_p13), %s2147_s25, 8  ;;  %s240_s23 = scalar_lea.sflag (!%p2009_p13), [#allocation7], %s2147_s25 }
  0x7f   : > { %s2151_s28 = scalar_lea.vmem (!%p2009_p13), [#allocation6], %s1417_s30  ;;  %p2655_p9 = scmp.ne.s32.totalorder (!%p2009_p13), %s2643_s19, 0 }
  0x84   : > { %1863 = dma.done.wait (%p2655_p9), %s240_s23, 4096  }
  0x85   : > { %1865 = vsyncadd (%p2655_p9), %s240_s23, 4294963200  ;;  %p2656_p12 = scmp.eq.s32.totalorder %s1990_s0, 0 }
  0x87   : > { %1867 = dma.done.wait (%p2656_p12), [#allocation10], 8192   ;;  %p2657_p13 = pmov %p2656_p12 }
  0x88   : > { %s1420_s21 = sshll.u32 %s2147_s25, 10  ;;  %s2165_s9 = smov 0  }
  0x89   : > { %1869 = vsyncadd (%p2657_p13), [#allocation10], 4294959104  ;;  %s2163_s11 = scalar_lea.vmem [#allocation12], %s1420_s21 }
  0x8a LB: >> { %s2658_s10 = sshll.u32 %s1990_s0, 8  ;;  %s292_s12 = sshrl.u32 %s1894_s9, 3  ;;  %s1894_s9 = sphi %s2165_s9, %s286_s9  }
  0x8b   : >> { %s287_s19 = sadd.s32 %s1894_s9, %s2658_s10  ;;  %s293_s22 = sand.u32 7, %s1894_s9  }
  0x8c   : >> { %s288_s13 = smul.u32 3, %s287_s19  ;;  %s2195_s18 = scalar_lea.hbm %s2627_s6, 3072 }
  0x8d   : >> { %s294_s29 = smul.u32 24, %s292_s12 }
  0x8e   : >> { %s289_s26 = sld [smem:[#allocation5 + %s288_s13]]  ;;  %s308_s8 = sadd.s32 1, %s288_s13 }
  0x8f   : >> { %s295_s30 = sadd.s32 %s294_s29, %s293_s22  ;;  %s2175_s23 = sld [smem:[#allocation5 + %s308_s8]] }
  0x90   : >> { %s325_s21 = sadd.s32 2, %s288_s13  ;;  %s2177_s1 = scalar_lea.vmem [#allocation2], %s295_s30 }
  0x91   : >> { %s304_s2 = sshll.u32 %s2177_s1, 4  ;;  %s1341_s4 = scalar_lea.vmem %s2177_s1, 8 [#allocation2]  ;;  %s2181_s2 = int_to_ptr.vmem [resolvable:$true] %s304_s2 }
  0x92   : >> { %s321_s10 = sshll.u32 %s1341_s4, 4  ;;  %s2185_s19 = sld [smem:[#allocation5 + %s325_s21]]  ;;  %s2183_s10 = int_to_ptr.vmem [resolvable:$true] %s321_s10 }
  0x93   : >> { %s1347_s22 = scalar_lea.vmem %s2177_s1, 16 [#allocation2] }
  0x94   : >> { %s1422_s12 = sshll.u32 %s289_s26, 4 }
  0x95   : >> { %s291_s13 = scalar_lea.hbm %s2627_s6, %s1422_s12  ;;  %s1423_s30 = sshll.u32 %s2175_s23, 4 }
  0x96   : >> { %s1736_s27 = scalar_lea.hbm %s291_s13, 16  ;;  %p1739_p5 = scmp.lt.u32.totalorder %s291_s13, %s2627_s6 }
  0x97   : >> { %p1737_p2 = scmp.ne.s32.totalorder %s291_s13, %s1736_s27  ;;  %p1740_p6 = scmp.lt.u32.totalorder %s2195_s18, %s1736_s27 }
  0x98   : >> { %p1742_p10 = scmp.lt.u32.totalorder %s1736_s27, %s291_s13 }
  0x99   : >> { %p1741_p8 = por %p1740_p6, %p1739_p5 }
  0x9b   : >> { %p1743_p0 = por %p1742_p10, %p1741_p8 }
  0x9d   : >> { %p1744_p3 = pnand %p1743_p0, %p1737_p2 }
  0x9f   : >> { %1747 = shalt.err (!%p1744_p3)  }
  0xa0   : >> { %s1748_s1 = scalar_lea.vmem %s2181_s2, 16  ;;  %s1908_s26 = smov [#allocation2]  }
  0xa1   : >> { %p1749_p7 = scmp.ne.s32.totalorder %s2181_s2, %s1748_s1  ;;  %s1750_s15 = sshll.u32 %s1908_s26, 4  ;;  %s2203_s15 = int_to_ptr.vmem [resolvable:$false] %s1750_s15 }
  0xa2   : >> { %s2206_s16 = scalar_lea.vmem %s2203_s15, 12288  ;;  %p1753_p4 = scmp.lt.s32.totalorder %s2181_s2, %s2203_s15 }
  0xa3   : >> { %p1754_p11 = scmp.lt.s32.totalorder %s2206_s16, %s1748_s1 }
  0xa5   : >> { %p1755_p1 = por %p1754_p11, %p1753_p4 }
  0xa7   : >> { %p1756_p9 = pnand %p1755_p1, %p1749_p7 }
  0xa9   : >> { %1759 = shalt.err (!%p1756_p9)  }
  0xaa   : >> { %307 = dma.hbm_to_vmem [thread:$0]  %s291_s13, 16, %s2181_s2, [#allocation3] }
  0xab   : >> { %s311_s23 = scalar_lea.hbm %s2627_s6, %s1423_s30  ;;  %s338_s21 = sshll.u32 %s1347_s22, 4  ;;  %s339_s21 = int_to_ptr.vmem [resolvable:$true] %s338_s21 }
  0xac   : >> { %s1760_s12 = scalar_lea.hbm %s311_s23, 16  ;;  %p1763_p13 = scmp.lt.u32.totalorder %s311_s23, %s2627_s6 }
  0xad   : >> { %p1761_p12 = scmp.ne.s32.totalorder %s311_s23, %s1760_s12  ;;  %p1764_p2 = scmp.lt.u32.totalorder %s2195_s18, %s1760_s12 }
  0xae   : >> { %p1766_p6 = scmp.lt.u32.totalorder %s1760_s12, %s311_s23 }
  0xaf   : >> { %p1765_p5 = por %p1764_p2, %p1763_p13 }
  0xb1   : >> { %p1767_p8 = por %p1766_p6, %p1765_p5 }
  0xb3   : >> { %p1768_p10 = pnand %p1767_p8, %p1761_p12 }
  0xb5   : >> { %1771 = shalt.err (!%p1768_p10)  }
  0xb6   : >> { %s1772_s2 = scalar_lea.vmem %s2183_s10, 16  ;;  %p1777_p3 = scmp.lt.s32.totalorder %s2183_s10, %s2203_s15 }
  0xb7   : >> { %p1773_p0 = scmp.ne.s32.totalorder %s2183_s10, %s1772_s2  ;;  %p1778_p7 = scmp.lt.s32.totalorder %s2206_s16, %s1772_s2 }
  0xb9   : >> { %p1779_p4 = por %p1778_p7, %p1777_p3 }
  0xbb   : >> { %p1780_p11 = pnand %p1779_p4, %p1773_p0 }
  0xbd   : >> { %1783 = shalt.err (!%p1780_p11)  }
  0xbe   : >> { %324 = dma.hbm_to_vmem [thread:$0]  %s311_s23, 16, %s2183_s10, [#allocation3] }
  0xbf   : >> { %s1424_s22 = sshll.u32 %s2185_s19, 4 }
  0xc0   : >> { %s328_s4 = scalar_lea.hbm %s2627_s6, %s1424_s22 }
  0xc1   : >> { %s1784_s1 = scalar_lea.hbm %s328_s4, 16  ;;  %p1787_p9 = scmp.lt.u32.totalorder %s328_s4, %s2627_s6 }
  0xc2   : >> { %p1785_p1 = scmp.ne.s32.totalorder %s328_s4, %s1784_s1  ;;  %p1788_p12 = scmp.lt.u32.totalorder %s2195_s18, %s1784_s1 }
  0xc3   : >> { %p1790_p2 = scmp.lt.u32.totalorder %s1784_s1, %s328_s4 }
  0xc4   : >> { %p1789_p13 = por %p1788_p12, %p1787_p9 }
  0xc6   : >> { %p1791_p5 = por %p1790_p2, %p1789_p13 }
  0xc8   : >> { %p1792_p6 = pnand %p1791_p5, %p1785_p1 }
  0xca   : >> { %1795 = shalt.err (!%p1792_p6)  }
  0xcb   : >> { %s1796_s27 = scalar_lea.vmem %s339_s21, 16  ;;  %p1801_p10 = scmp.lt.s32.totalorder %s339_s21, %s2203_s15 }
  0xcc   : >> { %p1797_p8 = scmp.ne.s32.totalorder %s339_s21, %s1796_s27  ;;  %p1802_p0 = scmp.lt.s32.totalorder %s2206_s16, %s1796_s27 }
  0xce   : >> { %p1803_p3 = por %p1802_p0, %p1801_p10 }
  0xd0   : >> { %p1804_p7 = pnand %p1803_p3, %p1797_p8 }
  0xd2   : >> { %1807 = shalt.err (!%p1804_p7)  }
  0xd3   : >> { %341 = dma.hbm_to_vmem [thread:$0]  %s328_s4, 16, %s339_s21, [#allocation3] }
  0xd4   : >> { %s286_s9 = sadd.s32 1, %s1894_s9  }
  0xd5   : >> { %p283_p4 = scmp.ge.s32.totalorder %s286_s9, 256  }
  0xd6   : > { %v375_v0 = vld [vmem:[#allocation9 + $0x8] sm:$0xff] (%p283_p4)  ;;  %v377_v1 = vld [vmem:[#allocation9 + $0x18] sm:$0xff] (%p283_p4)  ;;  %v374_v2 = vld [vmem:[#allocation9] sm:$0xff] (%p283_p4)  ;;  %v1909_v7 = vmov (%p283_p4), 0.0   ;;  %v1910_v53 = vmov (%p283_p4), 0.0|0.0   ;;  %s1896_s19 = smov (%p283_p4), 0  }
  0xd7   : > { %285 = sbr.rel (!%p283_p4) target bundleno = 138 (0x8a), region = 125  ;;  %v1436_v3 = vpack.c.bf16 (%p283_p4), %v377_v1, %v375_v0  ;;  %v376_v4 = vld [vmem:[#allocation9 + $0x10] sm:$0xff] (%p283_p4)  ;;  %v379_v5 = vld [vmem:[#allocation9 + $0x28] sm:$0xff] (%p283_p4)  ;;  %v381_v6 = vld [vmem:[#allocation9 + $0x38] sm:$0xff] (%p283_p4)  ;;  %482 = vmatprep.mubr.f32.mxu0 (%p283_p4), %v1909_v7  ;;  %1516 = vmatprep.subr.bf16.mxu1 (%p283_p4), %v1910_v53 }
  0xd8   : > { %v1438_v8 = vpack.c.bf16 (%p283_p4), %v376_v4, %v374_v2  ;;  %v1440_v9 = vpack.c.bf16 (%p283_p4), %v381_v6, %v379_v5  ;;  %v378_v10 = vld [vmem:[#allocation9 + $0x20] sm:$0xff] (%p283_p4)  ;;  %v380_v11 = vld [vmem:[#allocation9 + $0x30] sm:$0xff] (%p283_p4)  ;;  %v383_v12 = vld [vmem:[#allocation9 + $0x48] sm:$0xff] (%p283_p4) }
  0xd9   : > { %1437 = vmatprep.subr.bf16.mxu0 (%p283_p4), %v1436_v3  ;;  %v385_v13 = vld [vmem:[#allocation9 + $0x58] sm:$0xff] (%p283_p4)  ;;  %v1442_v14 = vpack.c.bf16 (%p283_p4), %v380_v11, %v378_v10  ;;  %v382_v16 = vld [vmem:[#allocation9 + $0x40] sm:$0xff] (%p283_p4)  ;;  %v384_v17 = vld [vmem:[#allocation9 + $0x50] sm:$0xff] (%p283_p4) }
  0xda   : > { %1439 = vmatpush1.bf16.msra.mxu0 (%p283_p4), %v1438_v8  ;;  %v1444_v15 = vpack.c.bf16 (%p283_p4), %v385_v13, %v383_v12  ;;  %v387_v18 = vld [vmem:[#allocation9 + $0x68] sm:$0xff] (%p283_p4)  ;;  %v389_v19 = vld [vmem:[#allocation9 + $0x78] sm:$0xff] (%p283_p4)  ;;  %v1446_v20 = vpack.c.bf16 (%p283_p4), %v384_v17, %v382_v16  ;;  %v386_v22 = vld [vmem:[#allocation9 + $0x60] sm:$0xff] (%p283_p4) }
  0xdb   : > { %1441 = vmatprep.subr.bf16.mxu0 (%p283_p4), %v1440_v9  ;;  %v1448_v21 = vpack.c.bf16 (%p283_p4), %v389_v19, %v387_v18  ;;  %v388_v23 = vld [vmem:[#allocation9 + $0x70] sm:$0xff] (%p283_p4)  ;;  %v391_v24 = vld [vmem:[#allocation9 + $0x88] sm:$0xff] (%p283_p4)  ;;  %v393_v25 = vld [vmem:[#allocation9 + $0x98] sm:$0xff] (%p283_p4) }
  0xdc   : > { %v1450_v26 = vpack.c.bf16 (%p283_p4), %v388_v23, %v386_v22  ;;  %v1452_v27 = vpack.c.bf16 (%p283_p4), %v393_v25, %v391_v24  ;;  %v390_v28 = vld [vmem:[#allocation9 + $0x80] sm:$0xff] (%p283_p4)  ;;  %v392_v29 = vld [vmem:[#allocation9 + $0x90] sm:$0xff] (%p283_p4)  ;;  %v395_v30 = vld [vmem:[#allocation9 + $0xa8] sm:$0xff] (%p283_p4) }
  0xdd   : > { %v397_v31 = vld [vmem:[#allocation9 + $0xb8] sm:$0xff] (%p283_p4)  ;;  %v1454_v32 = vpack.c.bf16 (%p283_p4), %v392_v29, %v390_v28  ;;  %v394_v34 = vld [vmem:[#allocation9 + $0xa0] sm:$0xff] (%p283_p4)  ;;  %v396_v35 = vld [vmem:[#allocation9 + $0xb0] sm:$0xff] (%p283_p4) }
  0xde   : > { %1443 = vmatpush1.bf16.msra.mxu0 %v1442_v14  ;;  %v1456_v33 = vpack.c.bf16 %v397_v31, %v395_v30  ;;  %v399_v36 = vld [vmem:[#allocation9 + $0xc8] sm:$0xff]  ;;  %v401_v37 = vld [vmem:[#allocation9 + $0xd8] sm:$0xff]  ;;  %v1458_v38 = vpack.c.bf16 %v396_v35, %v394_v34  ;;  %v398_v40 = vld [vmem:[#allocation9 + $0xc0] sm:$0xff] }
  0xdf   : > { %1445 = vmatprep.subr.bf16.mxu0 %v1444_v15  ;;  %v1460_v39 = vpack.c.bf16 %v401_v37, %v399_v36  ;;  %v400_v41 = vld [vmem:[#allocation9 + $0xd0] sm:$0xff]  ;;  %v403_v42 = vld [vmem:[#allocation9 + $0xe8] sm:$0xff]  ;;  %v405_v43 = vld [vmem:[#allocation9 + $0xf8] sm:$0xff] }
  0xe0   : > { %v1462_v44 = vpack.c.bf16 %v400_v41, %v398_v40  ;;  %v1464_v45 = vpack.c.bf16 %v405_v43, %v403_v42  ;;  %v402_v46 = vld [vmem:[#allocation9 + $0xe0] sm:$0xff]  ;;  %v404_v47 = vld [vmem:[#allocation9 + $0xf0] sm:$0xff]  ;;  %v740_v50 = vld [vmem:[#allocation11 + $0x8] sm:$0xff] }
  0xe1   : > { %v1466_v48 = vpack.c.bf16 %v404_v47, %v402_v46  ;;  %v739_v49 = vld [vmem:[#allocation11] sm:$0xff]  ;;  %v741_v54 = vld [vmem:[#allocation11 + $0x10] sm:$0xff]  ;;  %v742_v55 = vld [vmem:[#allocation11 + $0x18] sm:$0xff] }
  0xe2   : > { %1447 = vmatpush1.bf16.msra.mxu0 %v1446_v20  ;;  %v342_v51 = vld [vmem:[%s2151_s28] sm:$0xff]  ;;  %v1469_v52 = vpack.c.bf16 %v740_v50, %v739_v49  ;;  %v343_v56 = vld [vmem:[%s2151_s28 + $0x8] sm:$0xff]  ;;  %v1472_v57 = vpack.c.bf16 %v742_v55, %v741_v54  ;;  %v344_v60 = vld [vmem:[%s2151_s28 + $0x10] sm:$0xff] }
  0xe3   : > { %1449 = vmatprep.subr.bf16.mxu0 %v1448_v21  ;;  %v743_v58 = vld [vmem:[#allocation11 + $0x20] sm:$0xff]  ;;  %v744_v59 = vld [vmem:[#allocation11 + $0x28] sm:$0xff]  ;;  %v745_v62 = vld [vmem:[#allocation11 + $0x30] sm:$0xff] }
  0xe4   : > { %1532 = vmatpush1.bf16.msra.mxu1 %v1469_v52  ;;  %v1475_v61 = vpack.c.bf16 %v744_v59, %v743_v58  ;;  %v746_v63 = vld [vmem:[#allocation11 + $0x38] sm:$0xff]  ;;  %v747_v2 = vld [vmem:[#allocation11 + $0x40] sm:$0xff]  ;;  %v748_v3 = vld [vmem:[#allocation11 + $0x48] sm:$0xff] }
  0xe5   : > { %1517 = vmatprep.subr.bf16.mxu1 %v1910_v53  ;;  %v345_v0 = vld [vmem:[%s2151_s28 + $0x18] sm:$0xff]  ;;  %v1478_v1 = vpack.c.bf16 %v746_v63, %v745_v62  ;;  %v346_v4 = vld [vmem:[%s2151_s28 + $0x20] sm:$0xff]  ;;  %v1481_v5 = vpack.c.bf16 %v748_v3, %v747_v2  ;;  %v749_v6 = vld [vmem:[#allocation11 + $0x50] sm:$0xff]  ;;  %v408_v3 = vlaneseq }
  0xe6   : > { %1451 = vmatpush1.bf16.msra.mxu0 %v1450_v26  ;;  %v750_v8 = vld [vmem:[#allocation11 + $0x58] sm:$0xff]  ;;  %v347_v9 = vld [vmem:[%s2151_s28 + $0x28] sm:$0xff]  ;;  %v751_v11 = vld [vmem:[#allocation11 + $0x60] sm:$0xff] }
  0xe7   : > { %1453 = vmatprep.subr.bf16.mxu0 %v1452_v27  ;;  %v1484_v10 = vpack.c.bf16 %v750_v8, %v749_v6  ;;  %v752_v12 = vld [vmem:[#allocation11 + $0x68] sm:$0xff]  ;;  %v348_v13 = vld [vmem:[%s2151_s28 + $0x30] sm:$0xff]  ;;  %v754_v16 = vld [vmem:[#allocation11 + $0x78] sm:$0xff] }
  0xe8   : > { %1533 = vmatpush1.bf16.msra.mxu1 %v1472_v57  ;;  %v1487_v14 = vpack.c.bf16 %v752_v12, %v751_v11  ;;  %v753_v15 = vld [vmem:[#allocation11 + $0x70] sm:$0xff]  ;;  %v349_v17 = vld [vmem:[%s2151_s28 + $0x38] sm:$0xff]  ;;  %v755_v19 = vld [vmem:[#allocation11 + $0x80] sm:$0xff] }
  0xe9   : > { %1518 = vmatprep.subr.bf16.mxu1 %v1910_v53  ;;  %v1490_v18 = vpack.c.bf16 %v754_v16, %v753_v15  ;;  %v756_v20 = vld [vmem:[#allocation11 + $0x88] sm:$0xff]  ;;  %v350_v21 = vld [vmem:[%s2151_s28 + $0x40] sm:$0xff]  ;;  %v757_v23 = vld [vmem:[#allocation11 + $0x90] sm:$0xff] }
  0xea   : > { %1455 = vmatpush1.bf16.msra.mxu0 %v1454_v32  ;;  %v1493_v22 = vpack.c.bf16 %v756_v20, %v755_v19  ;;  %v758_v24 = vld [vmem:[#allocation11 + $0x98] sm:$0xff]  ;;  %v351_v25 = vld [vmem:[%s2151_s28 + $0x48] sm:$0xff]  ;;  %v759_v27 = vld [vmem:[#allocation11 + $0xa0] sm:$0xff] }
  0xeb   : > { %1457 = vmatprep.subr.bf16.mxu0 %v1456_v33  ;;  %v1496_v26 = vpack.c.bf16 %v758_v24, %v757_v23  ;;  %v760_v28 = vld [vmem:[#allocation11 + $0xa8] sm:$0xff]  ;;  %v352_v29 = vld [vmem:[%s2151_s28 + $0x50] sm:$0xff]  ;;  %v762_v32 = vld [vmem:[#allocation11 + $0xb8] sm:$0xff] }
  0xec   : > { %1534 = vmatpush1.bf16.msra.mxu1 %v1475_v61  ;;  %v1499_v30 = vpack.c.bf16 %v760_v28, %v759_v27  ;;  %v761_v31 = vld [vmem:[#allocation11 + $0xb0] sm:$0xff]  ;;  %v353_v33 = vld [vmem:[%s2151_s28 + $0x58] sm:$0xff]  ;;  %v763_v35 = vld [vmem:[#allocation11 + $0xc0] sm:$0xff] }
  0xed   : > { %1519 = vmatprep.subr.bf16.mxu1 %v1910_v53  ;;  %v1502_v34 = vpack.c.bf16 %v762_v32, %v761_v31  ;;  %v764_v36 = vld [vmem:[#allocation11 + $0xc8] sm:$0xff]  ;;  %v354_v37 = vld [vmem:[%s2151_s28 + $0x60] sm:$0xff]  ;;  %v766_v40 = vld [vmem:[#allocation11 + $0xd8] sm:$0xff] }
  0xee   : > { %1459 = vmatpush1.bf16.msra.mxu0 %v1458_v38  ;;  %v1505_v38 = vpack.c.bf16 %v764_v36, %v763_v35  ;;  %v355_v41 = vld [vmem:[%s2151_s28 + $0x68] sm:$0xff]  ;;  %v356_v43 = vld [vmem:[%s2151_s28 + $0x70] sm:$0xff]  ;;  %v362_v49 = vld [vmem:[%s2151_s28 + $0xa0] sm:$0xff] }
  0xef   : > { %1461 = vmatprep.subr.bf16.mxu0 %v1460_v39  ;;  %v765_v39 = vld [vmem:[#allocation11 + $0xd0] sm:$0xff]  ;;  %v359_v46 = vld [vmem:[%s2151_s28 + $0x88] sm:$0xff]  ;;  %v767_v50 = vld [vmem:[#allocation11 + $0xe0] sm:$0xff] }
  0xf0   : > { %1535 = vmatpush1.bf16.msra.mxu1 %v1478_v1  ;;  %v1508_v42 = vpack.c.bf16 %v766_v40, %v765_v39  ;;  %v360_v47 = vld [vmem:[%s2151_s28 + $0x90] sm:$0xff]  ;;  %v365_v59 = vld [vmem:[%s2151_s28 + $0xb8] sm:$0xff]  ;;  %v370_v63 = vld [vmem:[%s2151_s28 + $0xe0] sm:$0xff] }
  0xf1   : > { %1520 = vmatprep.subr.bf16.mxu1 %v1910_v53  ;;  %v769_v55 = vld [vmem:[#allocation11 + $0xf0] sm:$0xff]  ;;  %v369_v62 = vld [vmem:[%s2151_s28 + $0xd8] sm:$0xff]  ;;  %v406_v6 = vld [vmem:[%s2624_s3] sm:$0x3] }
  0xf2   : > { %1463 = vmatpush1.bf16.msra.mxu0 %v1462_v44  ;;  %v357_v44 = vld [vmem:[%s2151_s28 + $0x78] sm:$0xff] }
  0xf3   : > { %1465 = vmatprep.subr.bf16.mxu0 %v1464_v45  ;;  %v358_v45 = vld [vmem:[%s2151_s28 + $0x80] sm:$0xff]  ;;  %v373_v2 = vld [vmem:[%s2151_s28 + $0xf8] sm:$0xff] }
  0xf4   : > { %1536 = vmatpush1.bf16.msra.mxu1 %v1481_v5 }
  0xf5   : > { %1521 = vmatprep.subr.bf16.mxu1 %v1910_v53 }
  0xf6   : > { %1467 = vmatpush1.bf16.msra.mxu0 %v1466_v48  ;;  %v361_v48 = vld [vmem:[%s2151_s28 + $0x98] sm:$0xff] }
  0xf7   : > { %1468 = vmatprep.subr.bf16.mxu0 %v1910_v53 }
  0xf8   : > { %1537 = vmatpush1.bf16.msra.mxu1 %v1484_v10 }
  0xf9   : > { %483 = vmatmul.mubr.f32.vlgmr.msra.gmra.mrb[0].mxu0 %v342_v51  ;;  %1522 = vmatprep.subr.bf16.mxu1 %v1910_v53  ;;  %v768_v51 = vld [vmem:[#allocation11 + $0xe8] sm:$0xff] }
  0xfa   : > { %488 = vmatprep.mubr.f32.mxu0 %v1909_v7  ;;  %1470 = vmatpush1.bf16.msra.mxu0 %v1469_v52  ;;  %v363_v52 = vld [vmem:[%s2151_s28 + $0xa8] sm:$0xff]  ;;  %v1511_v54 = vpack.c.bf16 %v768_v51, %v767_v50 }
  0xfb   : > { %1471 = vmatprep.subr.bf16.mxu0 %v1910_v53 }
  0xfc   : > { %1538 = vmatpush1.bf16.msra.mxu1 %v1487_v14 }
  0xfd   : > { %489 = vmatmul.mubr.f32.gmra.mrb[2].mxu0 %v343_v56  ;;  %1523 = vmatprep.subr.bf16.mxu1 %v1910_v53  ;;  %v770_v56 = vld [vmem:[#allocation11 + $0xf8] sm:$0xff] }
  0xfe   : > { %494 = vmatprep.mubr.f32.mxu0 %v1909_v7  ;;  %1473 = vmatpush1.bf16.msra.mxu0 %v1472_v57  ;;  %v364_v57 = vld [vmem:[%s2151_s28 + $0xb0] sm:$0xff]  ;;  %v1514_v58 = vpack.c.bf16 %v770_v56, %v769_v55 }
  0xff   : > { %1474 = vmatprep.subr.bf16.mxu0 %v1910_v53 }
 0x100   : > { %1539 = vmatpush1.bf16.msra.mxu1 %v1490_v18 }
 0x101   : > { %495 = vmatmul.mubr.f32.gmra.mrb[4].mxu0 %v344_v60  ;;  %1524 = vmatprep.subr.bf16.mxu1 %v1910_v53  ;;  %v366_v60 = vld [vmem:[%s2151_s28 + $0xc0] sm:$0xff] }
 0x102   : > { %500 = vmatprep.mubr.f32.mxu0 %v1909_v7  ;;  %1476 = vmatpush1.bf16.msra.mxu0 %v1475_v61  ;;  %v367_v61 = vld [vmem:[%s2151_s28 + $0xc8] sm:$0xff] }
 0x103   : > { %1477 = vmatprep.subr.bf16.mxu0 %v1910_v53 }
 0x104   : > { %1540 = vmatpush1.bf16.msra.mxu1 %v1493_v22 }
 0x105   : > { %501 = vmatmul.mubr.f32.gmra.mrb[6].mxu0 %v345_v0  ;;  %1525 = vmatprep.subr.bf16.mxu1 %v1910_v53  ;;  %v371_v0 = vld [vmem:[%s2151_s28 + $0xe8] sm:$0xff] }
 0x106   : > { %506 = vmatprep.mubr.f32.mxu0 %v1909_v7  ;;  %1479 = vmatpush1.bf16.msra.mxu0 %v1478_v1  ;;  %v372_v1 = vld [vmem:[%s2151_s28 + $0xf0] sm:$0xff] }
 0x107   : > { %1480 = vmatprep.subr.bf16.mxu0 %v1910_v53 }
 0x108   : > { %1541 = vmatpush1.bf16.msra.mxu1 %v1496_v26 }
 0x109   : > { %507 = vmatmul.mubr.f32.gmra.mrb[8].mxu0 %v346_v4  ;;  %1526 = vmatprep.subr.bf16.mxu1 %v1910_v53  ;;  %v409_v4 = vshrl.u32 %v408_v3, 7 }
 0x10a   : > { %512 = vmatprep.mubr.f32.mxu0 %v1909_v7  ;;  %1482 = vmatpush1.bf16.msra.mxu0 %v1481_v5 }
 0x10b   : > { %1483 = vmatprep.subr.bf16.mxu0 %v1910_v53  ;;  %v410_v5 = vsub.s32 0, %v409_v4  ;;  %v414_v8 = vsub.s32 1, %v409_v4 }
 0x10c   : > { %1542 = vmatpush1.bf16.msra.mxu1 %v1499_v30 }
 0x10d   : > { %513 = vmatmul.mubr.f32.gmra.mrb[10].mxu0 %v347_v9  ;;  %1527 = vmatprep.subr.bf16.mxu1 %v1910_v53  ;;  %v2337_v9 = vrot.slane %v406_v6, %v410_v5 }
 0x10e   : > { %518 = vmatprep.mubr.f32.mxu0 %v1909_v7  ;;  %1485 = vmatpush1.bf16.msra.mxu0 %v1484_v10  ;;  %v2339_v10 = vrot.slane %v406_v6, %v414_v8 }
 0x10f   : > { %1486 = vmatprep.subr.bf16.mxu0 %v1910_v53 }
 0x110   : > { %1543 = vmatpush1.bf16.msra.mxu1 %v1502_v34 }
 0x111   : > { %519 = vmatmul.mubr.f32.gmra.mrb[12].mxu0 %v348_v13  ;;  %1528 = vmatprep.subr.bf16.mxu1 %v1910_v53 }
 0x112   : > { %524 = vmatprep.mubr.f32.mxu0 %v1909_v7  ;;  %1488 = vmatpush1.bf16.msra.mxu0 %v1487_v14 }
 0x113   : > { %1489 = vmatprep.subr.bf16.mxu0 %v1910_v53 }
 0x114   : > { %1544 = vmatpush1.bf16.msra.mxu1 %v1505_v38 }
 0x115   : > { %525 = vmatmul.mubr.f32.gmra.mrb[14].mxu0 %v349_v17  ;;  %1529 = vmatprep.subr.bf16.mxu1 %v1910_v53 }
 0x116   : > { %530 = vmatprep.mubr.f32.mxu0 %v1909_v7  ;;  %1491 = vmatpush1.bf16.msra.mxu0 %v1490_v18 }
 0x117   : > { %1492 = vmatprep.subr.bf16.mxu0 %v1910_v53 }
 0x118   : > { %1545 = vmatpush1.bf16.msra.mxu1 %v1508_v42 }
 0x119   : > { %531 = vmatmul.mubr.f32.gmra.mrb[16].mxu0 %v350_v21  ;;  %1530 = vmatprep.subr.bf16.mxu1 %v1910_v53 }
 0x11a   : > { %536 = vmatprep.mubr.f32.mxu0 %v1909_v7  ;;  %1494 = vmatpush1.bf16.msra.mxu0 %v1493_v22 }
 0x11b   : > { %1495 = vmatprep.subr.bf16.mxu0 %v1910_v53 }
 0x11c   : > { %1546 = vmatpush1.bf16.msra.mxu1 %v1511_v54 }
 0x11d   : > { %537 = vmatmul.mubr.f32.gmra.mrb[18].mxu0 %v351_v25  ;;  %1531 = vmatprep.subr.bf16.mxu1 %v1910_v53 }
 0x11e   : > { %542 = vmatprep.mubr.f32.mxu0 %v1909_v7  ;;  %1497 = vmatpush1.bf16.msra.mxu0 %v1496_v26 }
 0x11f   : > { %1498 = vmatprep.subr.bf16.mxu0 %v1910_v53 }
 0x120   : > { %1547 = vmatpush1.bf16.msra.mxu1 %v1514_v58 }
 0x121   : > { %543 = vmatmul.mubr.f32.gmra.mrb[20].mxu0 %v352_v29 }
 0x122   : > { %548 = vmatprep.mubr.f32.mxu0 %v1909_v7  ;;  %1500 = vmatpush1.bf16.msra.mxu0 %v1499_v30 }
 0x123   : > { %1501 = vmatprep.subr.bf16.mxu0 %v1910_v53 }
 0x125   : > { %549 = vmatmul.mubr.f32.gmra.mrb[22].mxu0 %v353_v33 }
 0x126   : > { %554 = vmatprep.mubr.f32.mxu0 %v1909_v7  ;;  %1503 = vmatpush1.bf16.msra.mxu0 %v1502_v34 }
 0x127   : > { %1504 = vmatprep.subr.bf16.mxu0 %v1910_v53 }
 0x129   : > { %555 = vmatmul.mubr.f32.gmra.mrb[24].mxu0 %v354_v37 }
 0x12a   : > { %560 = vmatprep.mubr.f32.mxu0 %v1909_v7  ;;  %1506 = vmatpush1.bf16.msra.mxu0 %v1505_v38 }
 0x12b   : > { %1507 = vmatprep.subr.bf16.mxu0 %v1910_v53 }
 0x12d   : > { %561 = vmatmul.mubr.f32.gmra.mrb[26].mxu0 %v355_v41 }
 0x12e   : > { %566 = vmatprep.mubr.f32.mxu0 %v1909_v7  ;;  %1509 = vmatpush1.bf16.msra.mxu0 %v1508_v42 }
 0x12f   : > { %1510 = vmatprep.subr.bf16.mxu0 %v1910_v53 }
 0x131   : > { %567 = vmatmul.mubr.f32.gmra.mrb[28].mxu0 %v356_v43 }
 0x132   : > { %572 = vmatprep.mubr.f32.mxu0 %v1909_v7  ;;  %1512 = vmatpush1.bf16.msra.mxu0 %v1511_v54 }
 0x133   : > { %1513 = vmatprep.subr.bf16.mxu0 %v1910_v53  ;;  %v368_v53 = vld [vmem:[%s2151_s28 + $0xd0] sm:$0xff] }
 0x135   : > { %573 = vmatmul.mubr.f32.gmra.mrb[30].mxu0 %v357_v44 }
 0x136   : > { %578 = vmatprep.mubr.f32.mxu0 %v1909_v7  ;;  %1515 = vmatpush1.bf16.msra.mxu0 %v1514_v58 }
 0x139   : > { %579 = vmatmul.mubr.f32.gmra.mrb[32].mxu0 %v358_v45 }
 0x13a   : > { %584 = vmatprep.mubr.f32.mxu0 %v1909_v7 }
 0x13d   : > { %585 = vmatmul.mubr.f32.gmra.mrb[34].mxu0 %v359_v46 }
 0x13e   : > { %590 = vmatprep.mubr.f32.mxu0 %v1909_v7 }
 0x141   : > { %591 = vmatmul.mubr.f32.gmra.mrb[36].mxu0 %v360_v47 }
 0x142   : > { %596 = vmatprep.mubr.f32.mxu0 %v1909_v7 }
 0x145   : > { %597 = vmatmul.mubr.f32.gmra.mrb[38].mxu0 %v361_v48 }
 0x146   : > { %602 = vmatprep.mubr.f32.mxu0 %v1909_v7 }
 0x149   : > { %603 = vmatmul.mubr.f32.gmra.mrb[40].mxu0 %v362_v49 }
 0x14a   : > { %608 = vmatprep.mubr.f32.mxu0 %v1909_v7 }
 0x14d   : > { %609 = vmatmul.mubr.f32.gmra.mrb[42].mxu0 %v363_v52 }
 0x14e   : > { %614 = vmatprep.mubr.f32.mxu0 %v1909_v7 }
 0x151   : > { %615 = vmatmul.mubr.f32.gmra.mrb[44].mxu0 %v364_v57 }
 0x152   : > { %620 = vmatprep.mubr.f32.mxu0 %v1909_v7 }
 0x155   : > { %621 = vmatmul.mubr.f32.gmra.mrb[46].mxu0 %v365_v59 }
 0x156   : > { %626 = vmatprep.mubr.f32.mxu0 %v1909_v7 }
 0x159   : > { %627 = vmatmul.mubr.f32.gmra.mrb[48].mxu0 %v366_v60 }
 0x15a   : > { %632 = vmatprep.mubr.f32.mxu0 %v1909_v7 }
 0x15d   : > { %633 = vmatmul.mubr.f32.gmra.mrb[50].mxu0 %v367_v61 }
 0x15e   : > { %638 = vmatprep.mubr.f32.mxu0 %v1909_v7 }
 0x161   : > { %639 = vmatmul.mubr.f32.gmra.mrb[52].mxu0 %v368_v53 }
 0x162   : > { %644 = vmatprep.mubr.f32.mxu0 %v1909_v7 }
 0x165   : > { %645 = vmatmul.mubr.f32.gmra.mrb[54].mxu0 %v369_v62 }
 0x166   : > { %650 = vmatprep.mubr.f32.mxu0 %v1909_v7 }
 0x169   : > { %651 = vmatmul.mubr.f32.gmra.mrb[56].mxu0 %v370_v63 }
 0x16a   : > { %656 = vmatprep.mubr.f32.mxu0 %v1909_v7 }
 0x16d   : > { %657 = vmatmul.mubr.f32.gmra.mrb[58].mxu0 %v371_v0 }
 0x16e   : > { %662 = vmatprep.mubr.f32.mxu0 %v1909_v7 }
 0x171   : > { %663 = vmatmul.mubr.f32.gmra.mrb[60].mxu0 %v372_v1 }
 0x172   : > { %668 = vmatprep.mubr.f32.mxu0 %v1909_v7 }
 0x175   : > { %669 = vmatmul.mubr.f32.gmra.mrb[62].mxu0 %v373_v2 }
 0x1cc   : > { %v484_v11 = vpop.f32.mrb[0].mxu0 }
 0x1cd   : > { %v485_v12 = vadd.f32 %v484_v11, %v2337_v9  ;;  %v486_v13 = vpop.f32.mrb[1].mxu0 }
 0x1ce   : > { %v487_v7 = vadd.f32 %v486_v13, %v2339_v10 }
 0x1cf   : > { %v675_v16 = vmax.f32 %v485_v12, 0.0 }
 0x1d0   : > { %v676_v14 = vmax.f32 %v487_v7, 0.0  ;;  %v490_v15 = vpop.f32.mrb[2].mxu0 }
 0x1d1   : > { %v491_v17 = vadd.f32 %v490_v15, %v2337_v9  ;;  %v492_v18 = vpop.f32.mrb[3].mxu0 }
 0x1d2   : > { %v493_v19 = vadd.f32 %v492_v18, %v2339_v10  ;;  %842 = vmatprep.mubr.f32.mxu0 %v676_v14 }
 0x1d3   : > { %843 = vmatmul.mubr.f32.vlgmr.msra.gmra.mrb[64].mxu0 %v675_v16  ;;  %v677_v22 = vmax.f32 %v491_v17, 0.0 }
 0x1d4   : > { %v678_v20 = vmax.f32 %v493_v19, 0.0  ;;  %v496_v21 = vpop.f32.mrb[4].mxu0 }
 0x1d5   : > { %v497_v23 = vadd.f32 %v496_v21, %v2337_v9  ;;  %v498_v24 = vpop.f32.mrb[5].mxu0 }
 0x1d6   : > { %v499_v25 = vadd.f32 %v498_v24, %v2339_v10  ;;  %847 = vmatprep.mubr.f32.mxu0 %v678_v20 }
 0x1d7   : > { %848 = vmatmul.mubr.f32.gmra.mrb[66].mxu0 %v677_v22  ;;  %v679_v28 = vmax.f32 %v497_v23, 0.0 }
 0x1d8   : > { %v680_v26 = vmax.f32 %v499_v25, 0.0  ;;  %v502_v27 = vpop.f32.mrb[6].mxu0 }
 0x1d9   : > { %v503_v29 = vadd.f32 %v502_v27, %v2337_v9  ;;  %v504_v30 = vpop.f32.mrb[7].mxu0 }
 0x1da   : > { %v505_v31 = vadd.f32 %v504_v30, %v2339_v10  ;;  %852 = vmatprep.mubr.f32.mxu0 %v680_v26 }
 0x1db   : > { %853 = vmatmul.mubr.f32.gmra.mrb[68].mxu0 %v679_v28  ;;  %v681_v34 = vmax.f32 %v503_v29, 0.0 }
 0x1dc   : > { %v682_v32 = vmax.f32 %v505_v31, 0.0  ;;  %v508_v33 = vpop.f32.mrb[8].mxu0 }
 0x1dd   : > { %v509_v35 = vadd.f32 %v508_v33, %v2337_v9  ;;  %v510_v36 = vpop.f32.mrb[9].mxu0 }
 0x1de   : > { %857 = vmatprep.mubr.f32.mxu0 %v682_v32  ;;  %v511_v37 = vadd.f32 %v510_v36, %v2339_v10 }
 0x1df   : > { %858 = vmatmul.mubr.f32.gmra.mrb[70].mxu0 %v681_v34  ;;  %v683_v40 = vmax.f32 %v509_v35, 0.0 }
 0x1e0   : > { %v514_v38 = vpop.f32.mrb[10].mxu0  ;;  %v684_v39 = vmax.f32 %v511_v37, 0.0 }
 0x1e1   : > { %v515_v41 = vadd.f32 %v514_v38, %v2337_v9  ;;  %v516_v42 = vpop.f32.mrb[11].mxu0 }
 0x1e2   : > { %v517_v43 = vadd.f32 %v516_v42, %v2339_v10  ;;  %862 = vmatprep.mubr.f32.mxu1 %v684_v39 }
 0x1e3   : > { %863 = vmatmul.mubr.f32.vlgmr.msra.gmra.mrb[0].mxu1 %v683_v40  ;;  %v685_v46 = vmax.f32 %v515_v41, 0.0 }
 0x1e4   : > { %v686_v44 = vmax.f32 %v517_v43, 0.0  ;;  %v520_v45 = vpop.f32.mrb[12].mxu0 }
 0x1e5   : > { %v521_v47 = vadd.f32 %v520_v45, %v2337_v9  ;;  %v522_v48 = vpop.f32.mrb[13].mxu0 }
 0x1e6   : > { %v523_v49 = vadd.f32 %v522_v48, %v2339_v10  ;;  %867 = vmatprep.mubr.f32.mxu1 %v686_v44 }
 0x1e7   : > { %868 = vmatmul.mubr.f32.gmra.mrb[2].mxu1 %v685_v46  ;;  %v687_v52 = vmax.f32 %v521_v47, 0.0 }
 0x1e8   : > { %v688_v50 = vmax.f32 %v523_v49, 0.0  ;;  %v526_v51 = vpop.f32.mrb[14].mxu0 }
 0x1e9   : > { %v527_v54 = vadd.f32 %v526_v51, %v2337_v9  ;;  %v528_v55 = vpop.f32.mrb[15].mxu0 }
 0x1ea   : > { %v529_v56 = vadd.f32 %v528_v55, %v2339_v10  ;;  %872 = vmatprep.mubr.f32.mxu1 %v688_v50 }
 0x1eb   : > { %873 = vmatmul.mubr.f32.gmra.mrb[4].mxu1 %v687_v52  ;;  %v689_v59 = vmax.f32 %v527_v54, 0.0 }
 0x1ec   : > { %v690_v57 = vmax.f32 %v529_v56, 0.0  ;;  %v532_v58 = vpop.f32.mrb[16].mxu0 }
 0x1ed   : > { %v533_v60 = vadd.f32 %v532_v58, %v2337_v9  ;;  %v534_v61 = vpop.f32.mrb[17].mxu0 }
 0x1ee   : > { %v535_v53 = vadd.f32 %v534_v61, %v2339_v10  ;;  %877 = vmatprep.mubr.f32.mxu1 %v690_v57 }
 0x1ef   : > { %878 = vmatmul.mubr.f32.gmra.mrb[6].mxu1 %v689_v59  ;;  %v691_v0 = vmax.f32 %v533_v60, 0.0 }
 0x1f0   : > { %v692_v62 = vmax.f32 %v535_v53, 0.0  ;;  %v538_v63 = vpop.f32.mrb[18].mxu0 }
 0x1f1   : > { %v539_v1 = vadd.f32 %v538_v63, %v2337_v9  ;;  %v540_v2 = vpop.f32.mrb[19].mxu0 }
 0x1f2   : > { %v541_v3 = vadd.f32 %v540_v2, %v2339_v10  ;;  %882 = vmatprep.mubr.f32.mxu1 %v692_v62 }
 0x1f3   : > { %883 = vmatmul.mubr.f32.gmra.mrb[8].mxu1 %v691_v0  ;;  %v693_v6 = vmax.f32 %v539_v1, 0.0 }
 0x1f4   : > { %v694_v4 = vmax.f32 %v541_v3, 0.0  ;;  %v544_v5 = vpop.f32.mrb[20].mxu0 }
 0x1f5   : > { %v545_v8 = vadd.f32 %v544_v5, %v2337_v9  ;;  %v546_v11 = vpop.f32.mrb[21].mxu0 }
 0x1f6   : > { %v547_v12 = vadd.f32 %v546_v11, %v2339_v10  ;;  %887 = vmatprep.mubr.f32.mxu1 %v694_v4 }
 0x1f7   : > { %888 = vmatmul.mubr.f32.gmra.mrb[10].mxu1 %v693_v6  ;;  %v695_v14 = vmax.f32 %v545_v8, 0.0 }
 0x1f8   : > { %v696_v13 = vmax.f32 %v547_v12, 0.0  ;;  %v550_v7 = vpop.f32.mrb[22].mxu0 }
 0x1f9   : > { %v551_v15 = vadd.f32 %v550_v7, %v2337_v9  ;;  %v552_v16 = vpop.f32.mrb[23].mxu0 }
 0x1fa   : > { %v553_v17 = vadd.f32 %v552_v16, %v2339_v10  ;;  %892 = vmatprep.mubr.f32.mxu1 %v696_v13 }
 0x1fb   : > { %893 = vmatmul.mubr.f32.gmra.mrb[12].mxu1 %v695_v14  ;;  %v697_v20 = vmax.f32 %v551_v15, 0.0 }
 0x1fc   : > { %v698_v18 = vmax.f32 %v553_v17, 0.0  ;;  %v556_v19 = vpop.f32.mrb[24].mxu0 }
 0x1fd   : > { %v557_v21 = vadd.f32 %v556_v19, %v2337_v9  ;;  %v558_v22 = vpop.f32.mrb[25].mxu0 }
 0x1fe   : > { %v559_v23 = vadd.f32 %v558_v22, %v2339_v10  ;;  %897 = vmatprep.mubr.f32.mxu1 %v698_v18 }
 0x1ff   : > { %898 = vmatmul.mubr.f32.gmra.mrb[14].mxu1 %v697_v20  ;;  %v699_v26 = vmax.f32 %v557_v21, 0.0 }
 0x200   : > { %v700_v24 = vmax.f32 %v559_v23, 0.0  ;;  %v562_v25 = vpop.f32.mrb[26].mxu0 }
 0x201   : > { %v563_v27 = vadd.f32 %v562_v25, %v2337_v9  ;;  %v564_v28 = vpop.f32.mrb[27].mxu0 }
 0x202   : > { %v565_v29 = vadd.f32 %v564_v28, %v2339_v10  ;;  %902 = vmatprep.mubr.f32.mxu1 %v700_v24 }
 0x203   : > { %903 = vmatmul.mubr.f32.gmra.mrb[16].mxu1 %v699_v26  ;;  %v701_v32 = vmax.f32 %v563_v27, 0.0 }
 0x204   : > { %v702_v30 = vmax.f32 %v565_v29, 0.0  ;;  %v568_v31 = vpop.f32.mrb[28].mxu0 }
 0x205   : > { %v569_v33 = vadd.f32 %v568_v31, %v2337_v9  ;;  %v570_v34 = vpop.f32.mrb[29].mxu0 }
 0x206   : > { %v571_v35 = vadd.f32 %v570_v34, %v2339_v10  ;;  %907 = vmatprep.mubr.f32.mxu1 %v702_v30 }
 0x207   : > { %908 = vmatmul.mubr.f32.gmra.mrb[18].mxu1 %v701_v32  ;;  %v703_v38 = vmax.f32 %v569_v33, 0.0 }
 0x208   : > { %v704_v36 = vmax.f32 %v571_v35, 0.0  ;;  %v574_v37 = vpop.f32.mrb[30].mxu0 }
 0x209   : > { %v575_v39 = vadd.f32 %v574_v37, %v2337_v9  ;;  %v576_v40 = vpop.f32.mrb[31].mxu0 }
 0x20a   : > { %v577_v41 = vadd.f32 %v576_v40, %v2339_v10  ;;  %912 = vmatprep.mubr.f32.mxu1 %v704_v36 }
 0x20b   : > { %913 = vmatmul.mubr.f32.gmra.mrb[20].mxu1 %v703_v38  ;;  %v705_v44 = vmax.f32 %v575_v39, 0.0 }
 0x20c   : > { %v706_v42 = vmax.f32 %v577_v41, 0.0  ;;  %v580_v43 = vpop.f32.mrb[32].mxu0 }
 0x20d   : > { %v581_v45 = vadd.f32 %v580_v43, %v2337_v9  ;;  %v582_v46 = vpop.f32.mrb[33].mxu0 }
 0x20e   : > { %v583_v47 = vadd.f32 %v582_v46, %v2339_v10  ;;  %917 = vmatprep.mubr.f32.mxu1 %v706_v42 }
 0x20f   : > { %918 = vmatmul.mubr.f32.gmra.mrb[22].mxu1 %v705_v44  ;;  %v707_v50 = vmax.f32 %v581_v45, 0.0 }
 0x210   : > { %v708_v48 = vmax.f32 %v583_v47, 0.0  ;;  %v586_v49 = vpop.f32.mrb[34].mxu0 }
 0x211   : > { %v587_v51 = vadd.f32 %v586_v49, %v2337_v9  ;;  %v588_v52 = vpop.f32.mrb[35].mxu0 }
 0x212   : > { %v589_v54 = vadd.f32 %v588_v52, %v2339_v10  ;;  %922 = vmatprep.mubr.f32.mxu1 %v708_v48 }
 0x213   : > { %923 = vmatmul.mubr.f32.gmra.mrb[24].mxu1 %v707_v50  ;;  %v709_v57 = vmax.f32 %v587_v51, 0.0 }
 0x214   : > { %v710_v55 = vmax.f32 %v589_v54, 0.0  ;;  %v592_v56 = vpop.f32.mrb[36].mxu0 }
 0x215   : > { %v593_v58 = vadd.f32 %v592_v56, %v2337_v9  ;;  %v594_v59 = vpop.f32.mrb[37].mxu0 }
 0x216   : > { %v595_v60 = vadd.f32 %v594_v59, %v2339_v10  ;;  %927 = vmatprep.mubr.f32.mxu1 %v710_v55 }
 0x217   : > { %928 = vmatmul.mubr.f32.gmra.mrb[26].mxu1 %v709_v57  ;;  %v711_v62 = vmax.f32 %v593_v58, 0.0 }
 0x218   : > { %v712_v61 = vmax.f32 %v595_v60, 0.0  ;;  %v598_v53 = vpop.f32.mrb[38].mxu0 }
 0x219   : > { %v599_v63 = vadd.f32 %v598_v53, %v2337_v9  ;;  %v600_v0 = vpop.f32.mrb[39].mxu0 }
 0x21a   : > { %v601_v1 = vadd.f32 %v600_v0, %v2339_v10  ;;  %932 = vmatprep.mubr.f32.mxu1 %v712_v61 }
 0x21b   : > { %933 = vmatmul.mubr.f32.gmra.mrb[28].mxu1 %v711_v62  ;;  %v713_v4 = vmax.f32 %v599_v63, 0.0 }
 0x21c   : > { %v714_v2 = vmax.f32 %v601_v1, 0.0  ;;  %v604_v3 = vpop.f32.mrb[40].mxu0 }
 0x21d   : > { %v605_v5 = vadd.f32 %v604_v3, %v2337_v9  ;;  %v606_v6 = vpop.f32.mrb[41].mxu0 }
 0x21e   : > { %v607_v8 = vadd.f32 %v606_v6, %v2339_v10  ;;  %937 = vmatprep.mubr.f32.mxu1 %v714_v2 }
 0x21f   : > { %938 = vmatmul.mubr.f32.gmra.mrb[30].mxu1 %v713_v4  ;;  %v715_v13 = vmax.f32 %v605_v5, 0.0 }
 0x220   : > { %v716_v11 = vmax.f32 %v607_v8, 0.0  ;;  %v610_v12 = vpop.f32.mrb[42].mxu0 }
 0x221   : > { %v611_v7 = vadd.f32 %v610_v12, %v2337_v9  ;;  %v612_v14 = vpop.f32.mrb[43].mxu0 }
 0x222   : > { %v613_v15 = vadd.f32 %v612_v14, %v2339_v10  ;;  %942 = vmatprep.mubr.f32.mxu1 %v716_v11 }
 0x223   : > { %943 = vmatmul.mubr.f32.gmra.mrb[32].mxu1 %v715_v13  ;;  %v717_v18 = vmax.f32 %v611_v7, 0.0 }
 0x224   : > { %v718_v16 = vmax.f32 %v613_v15, 0.0  ;;  %v616_v17 = vpop.f32.mrb[44].mxu0 }
 0x225   : > { %v617_v19 = vadd.f32 %v616_v17, %v2337_v9  ;;  %v618_v20 = vpop.f32.mrb[45].mxu0 }
 0x226   : > { %v619_v21 = vadd.f32 %v618_v20, %v2339_v10  ;;  %947 = vmatprep.mubr.f32.mxu1 %v718_v16  ;;  %v2408_v16 = vld [vmem:[%s2626_s5] ss:$0 sm:$0xff] }
 0x227   : > { %948 = vmatmul.mubr.f32.gmra.mrb[34].mxu1 %v717_v18  ;;  %v719_v24 = vmax.f32 %v617_v19, 0.0 }
 0x228   : > { %v720_v22 = vmax.f32 %v619_v21, 0.0  ;;  %v622_v23 = vpop.f32.mrb[46].mxu0 }
 0x229   : > { %v623_v25 = vadd.f32 %v622_v23, %v2337_v9  ;;  %v624_v26 = vpop.f32.mrb[47].mxu0 }
 0x22a   : > { %v625_v27 = vadd.f32 %v624_v26, %v2339_v10  ;;  %952 = vmatprep.mubr.f32.mxu1 %v720_v22 }
 0x22b   : > { %953 = vmatmul.mubr.f32.gmra.mrb[36].mxu1 %v719_v24  ;;  %v721_v30 = vmax.f32 %v623_v25, 0.0 }
 0x22c   : > { %v722_v28 = vmax.f32 %v625_v27, 0.0  ;;  %v628_v29 = vpop.f32.mrb[48].mxu0 }
 0x22d   : > { %v629_v31 = vadd.f32 %v628_v29, %v2337_v9  ;;  %v630_v32 = vpop.f32.mrb[49].mxu0 }
 0x22e   : > { %v631_v33 = vadd.f32 %v630_v32, %v2339_v10  ;;  %957 = vmatprep.mubr.f32.mxu1 %v722_v28 }
 0x22f   : > { %958 = vmatmul.mubr.f32.gmra.mrb[38].mxu1 %v721_v30  ;;  %v723_v36 = vmax.f32 %v629_v31, 0.0 }
 0x230   : > { %v724_v34 = vmax.f32 %v631_v33, 0.0  ;;  %v634_v35 = vpop.f32.mrb[50].mxu0 }
 0x231   : > { %v635_v37 = vadd.f32 %v634_v35, %v2337_v9  ;;  %v636_v38 = vpop.f32.mrb[51].mxu0 }
 0x232   : > { %v637_v39 = vadd.f32 %v636_v38, %v2339_v10  ;;  %962 = vmatprep.mubr.f32.mxu1 %v724_v34 }
 0x233   : > { %963 = vmatmul.mubr.f32.gmra.mrb[40].mxu1 %v723_v36  ;;  %v725_v42 = vmax.f32 %v635_v37, 0.0 }
 0x234   : > { %v726_v40 = vmax.f32 %v637_v39, 0.0  ;;  %v640_v41 = vpop.f32.mrb[52].mxu0 }
 0x235   : > { %v641_v43 = vadd.f32 %v640_v41, %v2337_v9  ;;  %v642_v44 = vpop.f32.mrb[53].mxu0 }
 0x236   : > { %v643_v45 = vadd.f32 %v642_v44, %v2339_v10  ;;  %967 = vmatprep.mubr.f32.mxu1 %v726_v40 }
 0x237   : > { %968 = vmatmul.mubr.f32.gmra.mrb[42].mxu1 %v725_v42  ;;  %v727_v48 = vmax.f32 %v641_v43, 0.0 }
 0x238   : > { %v728_v46 = vmax.f32 %v643_v45, 0.0  ;;  %v646_v47 = vpop.f32.mrb[54].mxu0 }
 0x239   : > { %v647_v49 = vadd.f32 %v646_v47, %v2337_v9  ;;  %v648_v50 = vpop.f32.mrb[55].mxu0 }
 0x23a   : > { %v649_v51 = vadd.f32 %v648_v50, %v2339_v10  ;;  %972 = vmatprep.mubr.f32.mxu1 %v728_v46 }
 0x23b   : > { %973 = vmatmul.mubr.f32.gmra.mrb[44].mxu1 %v727_v48  ;;  %v729_v55 = vmax.f32 %v647_v49, 0.0 }
 0x23c   : > { %v730_v52 = vmax.f32 %v649_v51, 0.0  ;;  %v652_v54 = vpop.f32.mrb[56].mxu0 }
 0x23d   : > { %v653_v56 = vadd.f32 %v652_v54, %v2337_v9  ;;  %v654_v57 = vpop.f32.mrb[57].mxu0 }
 0x23e   : > { %v655_v58 = vadd.f32 %v654_v57, %v2339_v10  ;;  %977 = vmatprep.mubr.f32.mxu1 %v730_v52 }
 0x23f   : > { %978 = vmatmul.mubr.f32.gmra.mrb[46].mxu1 %v729_v55  ;;  %v731_v61 = vmax.f32 %v653_v56, 0.0 }
 0x240   : > { %v732_v59 = vmax.f32 %v655_v58, 0.0  ;;  %v658_v60 = vpop.f32.mrb[58].mxu0 }
 0x241   : > { %v659_v53 = vadd.f32 %v658_v60, %v2337_v9  ;;  %v660_v62 = vpop.f32.mrb[59].mxu0 }
 0x242   : > { %v661_v63 = vadd.f32 %v660_v62, %v2339_v10  ;;  %982 = vmatprep.mubr.f32.mxu1 %v732_v59 }
 0x243   : > { %983 = vmatmul.mubr.f32.gmra.mrb[48].mxu1 %v731_v61  ;;  %v733_v2 = vmax.f32 %v659_v53, 0.0 }
 0x244   : > { %v734_v0 = vmax.f32 %v661_v63, 0.0  ;;  %v664_v1 = vpop.f32.mrb[60].mxu0 }
 0x245   : > { %v665_v3 = vadd.f32 %v664_v1, %v2337_v9  ;;  %v666_v4 = vpop.f32.mrb[61].mxu0 }
 0x246   : > { %v667_v5 = vadd.f32 %v666_v4, %v2339_v10  ;;  %987 = vmatprep.mubr.f32.mxu1 %v734_v0 }
 0x247   : > { %988 = vmatmul.mubr.f32.gmra.mrb[50].mxu1 %v733_v2  ;;  %v735_v11 = vmax.f32 %v665_v3, 0.0 }
 0x248   : > { %v736_v6 = vmax.f32 %v667_v5, 0.0  ;;  %v670_v8 = vpop.f32.mrb[62].mxu0 }
 0x249   : > { %v671_v12 = vadd.f32 %v670_v8, %v2337_v9  ;;  %v672_v13 = vpop.f32.mrb[63].mxu0 }
 0x24a   : > { %v673_v7 = vadd.f32 %v672_v13, %v2339_v10  ;;  %992 = vmatprep.mubr.f32.mxu1 %v736_v6 }
 0x24b   : > { %993 = vmatmul.mubr.f32.gmra.mrb[52].mxu1 %v735_v11  ;;  %v737_v15 = vmax.f32 %v671_v12, 0.0 }
 0x24c   : > { %v738_v14 = vmax.f32 %v673_v7, 0.0 }
 0x24e   : > { %997 = vmatprep.mubr.f32.mxu1 %v738_v14 }
 0x24f   : > { %998 = vmatmul.mubr.f32.gmra.mrb[54].mxu1 %v737_v15 }
 0x2a6   : > { %v844_v17 = vpop.f32.mrb[64].mxu0 }
 0x2a7   : > { %v845_v18 = vadd.f32 %v2408_v16, %v844_v17  ;;  %v846_v9 = vpop.f32.mrb[65].mxu0 }
 0x2a9   : > { %v1003_v19 = vmax.f32 %v845_v18, 0.0 }
 0x2aa   : > { %v849_v20 = vpop.f32.mrb[66].mxu0 }
 0x2ab   : > { %1035 = vst [vmem:[%s2163_s11] sm:$0xff] %v1003_v19  ;;  %v850_v10 = vadd.f32 %v2408_v16, %v849_v20  ;;  %v851_v21 = vpop.f32.mrb[67].mxu0 }
 0x2ad   : > { %v1004_v22 = vmax.f32 %v850_v10, 0.0 }
 0x2ae   : > { %v854_v23 = vpop.f32.mrb[68].mxu0 }
 0x2af   : > { %1036 = vst [vmem:[%s2163_s11 + $0x20] sm:$0xff] %v1004_v22  ;;  %v855_v24 = vadd.f32 %v2408_v16, %v854_v23  ;;  %v856_v25 = vpop.f32.mrb[69].mxu0 }
 0x2b1   : > { %v1005_v26 = vmax.f32 %v855_v24, 0.0 }
 0x2b2   : > { %v859_v27 = vpop.f32.mrb[70].mxu0 }
 0x2b3   : > { %1037 = vst [vmem:[%s2163_s11 + $0x40] sm:$0xff] %v1005_v26  ;;  %v860_v28 = vadd.f32 %v2408_v16, %v859_v27  ;;  %v861_v29 = vpop.f32.mrb[71].mxu0 }
 0x2b5   : > { %v1006_v30 = vmax.f32 %v860_v28, 0.0 }
 0x2b6   : > { %v864_v31 = vpop.f32.mrb[0].mxu1 }
 0x2b7   : > { %1038 = vst [vmem:[%s2163_s11 + $0x60] sm:$0xff] %v1006_v30  ;;  %v865_v32 = vadd.f32 %v2408_v16, %v864_v31  ;;  %v866_v33 = vpop.f32.mrb[1].mxu1 }
 0x2b9   : > { %v1007_v34 = vmax.f32 %v865_v32, 0.0 }
 0x2ba   : > { %v869_v35 = vpop.f32.mrb[2].mxu1 }
 0x2bb   : > { %1039 = vst [vmem:[%s2163_s11 + $0x80] sm:$0xff] %v1007_v34  ;;  %v870_v36 = vadd.f32 %v2408_v16, %v869_v35  ;;  %v871_v37 = vpop.f32.mrb[3].mxu1 }
 0x2bd   : > { %v1008_v38 = vmax.f32 %v870_v36, 0.0 }
 0x2be   : > { %v874_v39 = vpop.f32.mrb[4].mxu1 }
 0x2bf   : > { %1040 = vst [vmem:[%s2163_s11 + $0xa0] sm:$0xff] %v1008_v38  ;;  %v875_v40 = vadd.f32 %v2408_v16, %v874_v39  ;;  %v876_v41 = vpop.f32.mrb[5].mxu1 }
 0x2c1   : > { %v1009_v42 = vmax.f32 %v875_v40, 0.0 }
 0x2c2   : > { %v879_v43 = vpop.f32.mrb[6].mxu1 }
 0x2c3   : > { %1041 = vst [vmem:[%s2163_s11 + $0xc0] sm:$0xff] %v1009_v42  ;;  %v880_v44 = vadd.f32 %v2408_v16, %v879_v43  ;;  %v881_v45 = vpop.f32.mrb[7].mxu1 }
 0x2c5   : > { %v1010_v46 = vmax.f32 %v880_v44, 0.0 }
 0x2c6   : > { %v884_v47 = vpop.f32.mrb[8].mxu1 }
 0x2c7   : > { %1042 = vst [vmem:[%s2163_s11 + $0xe0] sm:$0xff] %v1010_v46  ;;  %v885_v48 = vadd.f32 %v2408_v16, %v884_v47  ;;  %v886_v49 = vpop.f32.mrb[9].mxu1 }
 0x2c9   : > { %v1011_v50 = vmax.f32 %v885_v48, 0.0 }
 0x2ca   : > { %v889_v51 = vpop.f32.mrb[10].mxu1 }
 0x2cb   : > { %1043 = vst [vmem:[%s2163_s11 + $0x100] sm:$0xff] %v1011_v50  ;;  %v890_v52 = vadd.f32 %v2408_v16, %v889_v51  ;;  %v891_v54 = vpop.f32.mrb[11].mxu1 }
 0x2cd   : > { %v1012_v55 = vmax.f32 %v890_v52, 0.0 }
 0x2ce   : > { %v894_v56 = vpop.f32.mrb[12].mxu1 }
 0x2cf   : > { %1044 = vst [vmem:[%s2163_s11 + $0x120] sm:$0xff] %v1012_v55  ;;  %v895_v57 = vadd.f32 %v2408_v16, %v894_v56  ;;  %v896_v58 = vpop.f32.mrb[13].mxu1 }
 0x2d1   : > { %v1013_v59 = vmax.f32 %v895_v57, 0.0 }
 0x2d2   : > { %v899_v60 = vpop.f32.mrb[14].mxu1 }
 0x2d3   : > { %1045 = vst [vmem:[%s2163_s11 + $0x140] sm:$0xff] %v1013_v59  ;;  %v900_v61 = vadd.f32 %v2408_v16, %v899_v60  ;;  %v901_v53 = vpop.f32.mrb[15].mxu1 }
 0x2d5   : > { %v1014_v62 = vmax.f32 %v900_v61, 0.0 }
 0x2d6   : > { %v904_v63 = vpop.f32.mrb[16].mxu1 }
 0x2d7   : > { %1046 = vst [vmem:[%s2163_s11 + $0x160] sm:$0xff] %v1014_v62  ;;  %v905_v0 = vadd.f32 %v2408_v16, %v904_v63  ;;  %v906_v1 = vpop.f32.mrb[17].mxu1 }
 0x2d9   : > { %v1015_v2 = vmax.f32 %v905_v0, 0.0 }
 0x2da   : > { %v909_v3 = vpop.f32.mrb[18].mxu1 }
 0x2db   : > { %1047 = vst [vmem:[%s2163_s11 + $0x180] sm:$0xff] %v1015_v2  ;;  %v910_v4 = vadd.f32 %v2408_v16, %v909_v3  ;;  %v911_v5 = vpop.f32.mrb[19].mxu1 }
 0x2dd   : > { %v1016_v6 = vmax.f32 %v910_v4, 0.0 }
 0x2de   : > { %v914_v8 = vpop.f32.mrb[20].mxu1 }
 0x2df   : > { %1048 = vst [vmem:[%s2163_s11 + $0x1a0] sm:$0xff] %v1016_v6  ;;  %v915_v11 = vadd.f32 %v2408_v16, %v914_v8  ;;  %v916_v12 = vpop.f32.mrb[21].mxu1 }
 0x2e1   : > { %v1017_v13 = vmax.f32 %v915_v11, 0.0 }
 0x2e2   : > { %v919_v7 = vpop.f32.mrb[22].mxu1 }
 0x2e3   : > { %1049 = vst [vmem:[%s2163_s11 + $0x1c0] sm:$0xff] %v1017_v13  ;;  %v920_v14 = vadd.f32 %v2408_v16, %v919_v7  ;;  %v921_v15 = vpop.f32.mrb[23].mxu1 }
 0x2e5   : > { %v1018_v17 = vmax.f32 %v920_v14, 0.0 }
 0x2e6   : > { %v924_v18 = vpop.f32.mrb[24].mxu1 }
 0x2e7   : > { %1050 = vst [vmem:[%s2163_s11 + $0x1e0] sm:$0xff] %v1018_v17  ;;  %v925_v9 = vadd.f32 %v2408_v16, %v924_v18  ;;  %v926_v19 = vpop.f32.mrb[25].mxu1 }
 0x2e9   : > { %v1019_v20 = vmax.f32 %v925_v9, 0.0 }
 0x2ea   : > { %v929_v10 = vpop.f32.mrb[26].mxu1 }
 0x2eb   : > { %1051 = vst [vmem:[%s2163_s11 + $0x200] sm:$0xff] %v1019_v20  ;;  %v930_v21 = vadd.f32 %v2408_v16, %v929_v10  ;;  %v931_v22 = vpop.f32.mrb[27].mxu1 }
 0x2ed   : > { %v1020_v23 = vmax.f32 %v930_v21, 0.0 }
 0x2ee   : > { %v934_v24 = vpop.f32.mrb[28].mxu1 }
 0x2ef   : > { %1052 = vst [vmem:[%s2163_s11 + $0x220] sm:$0xff] %v1020_v23  ;;  %v935_v25 = vadd.f32 %v2408_v16, %v934_v24  ;;  %v936_v26 = vpop.f32.mrb[29].mxu1 }
 0x2f1   : > { %v1021_v27 = vmax.f32 %v935_v25, 0.0 }
 0x2f2   : > { %v939_v28 = vpop.f32.mrb[30].mxu1 }
 0x2f3   : > { %1053 = vst [vmem:[%s2163_s11 + $0x240] sm:$0xff] %v1021_v27  ;;  %v940_v29 = vadd.f32 %v2408_v16, %v939_v28  ;;  %v941_v30 = vpop.f32.mrb[31].mxu1 }
 0x2f5   : > { %v1022_v31 = vmax.f32 %v940_v29, 0.0 }
 0x2f6   : > { %v944_v32 = vpop.f32.mrb[32].mxu1 }
 0x2f7   : > { %1054 = vst [vmem:[%s2163_s11 + $0x260] sm:$0xff] %v1022_v31  ;;  %v945_v33 = vadd.f32 %v2408_v16, %v944_v32  ;;  %v946_v34 = vpop.f32.mrb[33].mxu1 }
 0x2f9   : > { %v1023_v35 = vmax.f32 %v945_v33, 0.0 }
 0x2fa   : > { %v949_v36 = vpop.f32.mrb[34].mxu1 }
 0x2fb   : > { %1055 = vst [vmem:[%s2163_s11 + $0x280] sm:$0xff] %v1023_v35  ;;  %v950_v37 = vadd.f32 %v2408_v16, %v949_v36  ;;  %v951_v38 = vpop.f32.mrb[35].mxu1 }
 0x2fd   : > { %v1024_v39 = vmax.f32 %v950_v37, 0.0 }
 0x2fe   : > { %v954_v40 = vpop.f32.mrb[36].mxu1 }
 0x2ff   : > { %1056 = vst [vmem:[%s2163_s11 + $0x2a0] sm:$0xff] %v1024_v39  ;;  %v955_v41 = vadd.f32 %v2408_v16, %v954_v40  ;;  %v956_v42 = vpop.f32.mrb[37].mxu1 }
 0x301   : > { %v1025_v43 = vmax.f32 %v955_v41, 0.0 }
 0x302   : > { %v959_v44 = vpop.f32.mrb[38].mxu1 }
 0x303   : > { %1057 = vst [vmem:[%s2163_s11 + $0x2c0] sm:$0xff] %v1025_v43  ;;  %v960_v45 = vadd.f32 %v2408_v16, %v959_v44  ;;  %v961_v46 = vpop.f32.mrb[39].mxu1 }
 0x305   : > { %v1026_v47 = vmax.f32 %v960_v45, 0.0 }
 0x306   : > { %v964_v48 = vpop.f32.mrb[40].mxu1 }
 0x307   : > { %1058 = vst [vmem:[%s2163_s11 + $0x2e0] sm:$0xff] %v1026_v47  ;;  %v965_v49 = vadd.f32 %v2408_v16, %v964_v48  ;;  %v966_v50 = vpop.f32.mrb[41].mxu1 }
 0x309   : > { %v1027_v51 = vmax.f32 %v965_v49, 0.0 }
 0x30a   : > { %v969_v52 = vpop.f32.mrb[42].mxu1 }
 0x30b   : > { %1059 = vst [vmem:[%s2163_s11 + $0x300] sm:$0xff] %v1027_v51  ;;  %v970_v54 = vadd.f32 %v2408_v16, %v969_v52  ;;  %v971_v55 = vpop.f32.mrb[43].mxu1 }
 0x30d   : > { %v1028_v56 = vmax.f32 %v970_v54, 0.0 }
 0x30e   : > { %v974_v57 = vpop.f32.mrb[44].mxu1 }
 0x30f   : > { %1060 = vst [vmem:[%s2163_s11 + $0x320] sm:$0xff] %v1028_v56  ;;  %v975_v58 = vadd.f32 %v2408_v16, %v974_v57  ;;  %v976_v59 = vpop.f32.mrb[45].mxu1 }
 0x311   : > { %v1029_v60 = vmax.f32 %v975_v58, 0.0 }
 0x312   : > { %v979_v61 = vpop.f32.mrb[46].mxu1 }
 0x313   : > { %1061 = vst [vmem:[%s2163_s11 + $0x340] sm:$0xff] %v1029_v60  ;;  %v980_v53 = vadd.f32 %v2408_v16, %v979_v61  ;;  %v981_v62 = vpop.f32.mrb[47].mxu1 }
 0x315   : > { %v1030_v63 = vmax.f32 %v980_v53, 0.0 }
 0x316   : > { %v984_v0 = vpop.f32.mrb[48].mxu1 }
 0x317   : > { %1062 = vst [vmem:[%s2163_s11 + $0x360] sm:$0xff] %v1030_v63  ;;  %v985_v1 = vadd.f32 %v2408_v16, %v984_v0  ;;  %v986_v2 = vpop.f32.mrb[49].mxu1 }
 0x319   : > { %v1031_v3 = vmax.f32 %v985_v1, 0.0 }
 0x31a   : > { %v989_v4 = vpop.f32.mrb[50].mxu1 }
 0x31b   : > { %1063 = vst [vmem:[%s2163_s11 + $0x380] sm:$0xff] %v1031_v3  ;;  %v990_v5 = vadd.f32 %v2408_v16, %v989_v4  ;;  %v991_v6 = vpop.f32.mrb[51].mxu1 }
 0x31d   : > { %v1032_v8 = vmax.f32 %v990_v5, 0.0 }
 0x31e   : > { %v994_v11 = vpop.f32.mrb[52].mxu1 }
 0x31f   : > { %1064 = vst [vmem:[%s2163_s11 + $0x3a0] sm:$0xff] %v1032_v8  ;;  %v995_v12 = vadd.f32 %v2408_v16, %v994_v11  ;;  %v996_v13 = vpop.f32.mrb[53].mxu1 }
 0x321   : > { %v1033_v7 = vmax.f32 %v995_v12, 0.0 }
 0x322   : > { %v999_v14 = vpop.f32.mrb[54].mxu1 }
 0x323   : > { %1065 = vst [vmem:[%s2163_s11 + $0x3c0] sm:$0xff] %v1033_v7  ;;  %v1000_v15 = vadd.f32 %v2408_v16, %v999_v14  ;;  %v1001_v17 = vpop.f32.mrb[55].mxu1 }
 0x325   : > { %v1034_v18 = vmax.f32 %v1000_v15, 0.0 }
 0x327   : > { %1066 = vst [vmem:[%s2163_s11 + $0x3e0] sm:$0xff] %v1034_v18 }
 0x328 LB: >> { %1870 = dma.done.wait [#allocation3], 16  ;;  %s1898_s19 = sphi %s1896_s19, %s1072_s19  }
 0x329   : >> { %1871 = vsyncadd [#allocation3], 4294967280  ;;  %s1072_s19 = sadd.s32 1, %s1898_s19  }
 0x32a   : >> { %p1069_p11 = scmp.ge.s32.totalorder %s1072_s19, 768  }
 0x32b   : > { %v1076_v9 = vld [vmem:[#allocation2] sm:$0xff] (%p1069_p11)  ;;  %v1077_v16 = vld [vmem:[#allocation2 + $0x8] sm:$0xff] (%p1069_p11)  ;;  %v1078_v19 = vld [vmem:[#allocation2 + $0x10] sm:$0xff] (%p1069_p11)  ;;  %s1435_s15 = sshll.u32 (%p1069_p11), %s1990_s0, 14  ;;  %s1283_s16 = sshll.u32 (%p1069_p11), %s2163_s11, 4  ;;  %s2568_s16 = int_to_ptr.vmem [resolvable:$true] %s1283_s16 }
 0x32c   : > { %1071 = sbr.rel (!%p1069_p11) target bundleno = 808 (0x328), region = 136  ;;  %1172 = vst [vmem:[%s2163_s11 + $0x8] sm:$0xff] (%p1069_p11), %v1076_v9  ;;  %1173 = vst [vmem:[%s2163_s11 + $0x10] sm:$0xff] (%p1069_p11), %v1077_v16  ;;  %v1079_v20 = vld [vmem:[#allocation2 + $0x18] sm:$0xff] (%p1069_p11)  ;;  %v1080_v10 = vld [vmem:[#allocation2 + $0x20] sm:$0xff] (%p1069_p11)  ;;  %s2566_s21 = scalar_lea.hbm (%p1069_p11), %s2628_s7, %s1435_s15 }
 0x32d   : > { %1174 = vst [vmem:[%s2163_s11 + $0x18] sm:$0xff] (%p1069_p11), %v1078_v19  ;;  %v1081_v21 = vld [vmem:[#allocation2 + $0x28] sm:$0xff] (%p1069_p11)  ;;  %1175 = vst [vmem:[%s2163_s11 + $0x28] sm:$0xff] (%p1069_p11), %v1079_v20  ;;  %v1082_v22 = vld [vmem:[#allocation2 + $0x30] sm:$0xff] (%p1069_p11)  ;;  %s1269_s12 = scalar_lea.sflag (%p1069_p11), [#allocation8], %s2147_s25  ;;  %s1808_s29 = scalar_lea.vmem (%p1069_p11), %s2568_s16, 16384 }
 0x32e   : > { %1176 = vst [vmem:[%s2163_s11 + $0x30] sm:$0xff] (%p1069_p11), %v1080_v10  ;;  %1177 = vst [vmem:[%s2163_s11 + $0x38] sm:$0xff] (%p1069_p11), %v1081_v21  ;;  %v1083_v23 = vld [vmem:[#allocation2 + $0x38] sm:$0xff] (%p1069_p11)  ;;  %v1084_v24 = vld [vmem:[#allocation2 + $0x40] sm:$0xff] (%p1069_p11)  ;;  %p1809_p1 = scmp.ne.s32.totalorder (%p1069_p11), %s2568_s16, %s1808_s29  ;;  %p2659_p9 = scmp.ne.s32.totalorder (%p1069_p11), %s2652_s24, 0 }
 0x32f   : > { %1178 = vst [vmem:[%s2163_s11 + $0x48] sm:$0xff] (%p1069_p11), %v1082_v22  ;;  %1179 = vst [vmem:[%s2163_s11 + $0x50] sm:$0xff] (%p1069_p11), %v1083_v23  ;;  %v1085_v25 = vld [vmem:[#allocation2 + $0x48] sm:$0xff] (%p1069_p11)  ;;  %v1086_v26 = vld [vmem:[#allocation2 + $0x50] sm:$0xff] (%p1069_p11)  ;;  %s1911_s8 = smov (%p1069_p11), [#allocation12]  }
 0x330   : > { %1180 = vst [vmem:[%s2163_s11 + $0x58] sm:$0xff] (%p1069_p11), %v1084_v24  ;;  %v1087_v27 = vld [vmem:[#allocation2 + $0x58] sm:$0xff] (%p1069_p11)  ;;  %1181 = vst [vmem:[%s2163_s11 + $0x68] sm:$0xff] (%p1069_p11), %v1085_v25  ;;  %v1088_v28 = vld [vmem:[#allocation2 + $0x60] sm:$0xff] (%p1069_p11)  ;;  %p1810_p12 = pnand (%p1069_p11), %p1809_p1, %p2659_p9  ;;  %s1812_s2 = sshll.u32 (%p1069_p11), %s1911_s8, 4  ;;  %s1813_s2 = int_to_ptr.vmem [resolvable:$false] %s1812_s2 }
 0x331   : > { %1182 = vst [vmem:[%s2163_s11 + $0x70] sm:$0xff] (%p1069_p11), %v1086_v26  ;;  %1183 = vst [vmem:[%s2163_s11 + $0x78] sm:$0xff] (%p1069_p11), %v1087_v27  ;;  %v1089_v29 = vld [vmem:[#allocation2 + $0x68] sm:$0xff] (%p1069_p11)  ;;  %v1090_v30 = vld [vmem:[#allocation2 + $0x70] sm:$0xff] (%p1069_p11)  ;;  %s1814_s22 = scalar_lea.vmem (%p1069_p11), %s1813_s2, 32768  ;;  %p1815_p2 = scmp.lt.s32.totalorder (%p1069_p11), %s2568_s16, %s1813_s2 }
 0x332   : > { %1184 = vst [vmem:[%s2163_s11 + $0x88] sm:$0xff] (%p1069_p11), %v1088_v28  ;;  %1185 = vst [vmem:[%s2163_s11 + $0x90] sm:$0xff] (%p1069_p11), %v1089_v29  ;;  %v1091_v31 = vld [vmem:[#allocation2 + $0x78] sm:$0xff] (%p1069_p11)  ;;  %v1092_v32 = vld [vmem:[#allocation2 + $0x80] sm:$0xff] (%p1069_p11)  ;;  %p1811_p13 = pneg (%p1069_p11), %p1810_p12  ;;  %p1816_p5 = scmp.lt.s32.totalorder (%p1069_p11), %s1814_s22, %s1808_s29 }
 0x333   : > { %1186 = vst [vmem:[%s2163_s11 + $0x98] sm:$0xff] %v1090_v30  ;;  %v1093_v33 = vld [vmem:[#allocation2 + $0x88] sm:$0xff]  ;;  %1187 = vst [vmem:[%s2163_s11 + $0xa8] sm:$0xff] %v1091_v31  ;;  %v1094_v34 = vld [vmem:[#allocation2 + $0x90] sm:$0xff] }
 0x334   : > { %1188 = vst [vmem:[%s2163_s11 + $0xb0] sm:$0xff] %v1092_v32  ;;  %1189 = vst [vmem:[%s2163_s11 + $0xb8] sm:$0xff] %v1093_v33  ;;  %v1095_v35 = vld [vmem:[#allocation2 + $0x98] sm:$0xff]  ;;  %v1096_v36 = vld [vmem:[#allocation2 + $0xa0] sm:$0xff]  ;;  %p1817_p6 = por %p1816_p5, %p1815_p2 }
 0x335   : > { %1190 = vst [vmem:[%s2163_s11 + $0xc8] sm:$0xff] %v1094_v34  ;;  %1191 = vst [vmem:[%s2163_s11 + $0xd0] sm:$0xff] %v1095_v35  ;;  %v1097_v37 = vld [vmem:[#allocation2 + $0xa8] sm:$0xff]  ;;  %v1098_v38 = vld [vmem:[#allocation2 + $0xb0] sm:$0xff] }
 0x336   : > { %1192 = vst [vmem:[%s2163_s11 + $0xd8] sm:$0xff] %v1096_v36  ;;  %v1099_v39 = vld [vmem:[#allocation2 + $0xb8] sm:$0xff]  ;;  %1193 = vst [vmem:[%s2163_s11 + $0xe8] sm:$0xff] %v1097_v37  ;;  %v1100_v40 = vld [vmem:[#allocation2 + $0xc0] sm:$0xff]  ;;  %p1818_p8 = pnand %p1817_p6, %p1811_p13 }
 0x337   : > { %1194 = vst [vmem:[%s2163_s11 + $0xf0] sm:$0xff] %v1098_v38  ;;  %1195 = vst [vmem:[%s2163_s11 + $0xf8] sm:$0xff] %v1099_v39  ;;  %v1101_v41 = vld [vmem:[#allocation2 + $0xc8] sm:$0xff]  ;;  %v1102_v42 = vld [vmem:[#allocation2 + $0xd0] sm:$0xff] }
 0x338   : > { %1196 = vst [vmem:[%s2163_s11 + $0x108] sm:$0xff] %v1100_v40  ;;  %1197 = vst [vmem:[%s2163_s11 + $0x110] sm:$0xff] %v1101_v41  ;;  %v1103_v43 = vld [vmem:[#allocation2 + $0xd8] sm:$0xff]  ;;  %v1104_v44 = vld [vmem:[#allocation2 + $0xe0] sm:$0xff] }
 0x339   : > { %1198 = vst [vmem:[%s2163_s11 + $0x118] sm:$0xff] %v1102_v42  ;;  %v1105_v45 = vld [vmem:[#allocation2 + $0xe8] sm:$0xff]  ;;  %1199 = vst [vmem:[%s2163_s11 + $0x128] sm:$0xff] %v1103_v43  ;;  %v1106_v46 = vld [vmem:[#allocation2 + $0xf0] sm:$0xff] }
 0x33a   : > { %1200 = vst [vmem:[%s2163_s11 + $0x130] sm:$0xff] %v1104_v44  ;;  %1201 = vst [vmem:[%s2163_s11 + $0x138] sm:$0xff] %v1105_v45  ;;  %v1107_v47 = vld [vmem:[#allocation2 + $0xf8] sm:$0xff]  ;;  %v1108_v48 = vld [vmem:[#allocation2 + $0x100] sm:$0xff] }
 0x33b   : > { %1202 = vst [vmem:[%s2163_s11 + $0x148] sm:$0xff] %v1106_v46  ;;  %1203 = vst [vmem:[%s2163_s11 + $0x150] sm:$0xff] %v1107_v47  ;;  %v1109_v49 = vld [vmem:[#allocation2 + $0x108] sm:$0xff]  ;;  %v1110_v50 = vld [vmem:[#allocation2 + $0x110] sm:$0xff] }
 0x33c   : > { %1204 = vst [vmem:[%s2163_s11 + $0x158] sm:$0xff] %v1108_v48  ;;  %v1111_v51 = vld [vmem:[#allocation2 + $0x118] sm:$0xff]  ;;  %1205 = vst [vmem:[%s2163_s11 + $0x168] sm:$0xff] %v1109_v49  ;;  %v1112_v52 = vld [vmem:[#allocation2 + $0x120] sm:$0xff] }
 0x33d   : > { %1206 = vst [vmem:[%s2163_s11 + $0x170] sm:$0xff] %v1110_v50  ;;  %1207 = vst [vmem:[%s2163_s11 + $0x178] sm:$0xff] %v1111_v51  ;;  %v1113_v54 = vld [vmem:[#allocation2 + $0x128] sm:$0xff]  ;;  %v1114_v55 = vld [vmem:[#allocation2 + $0x130] sm:$0xff] }
 0x33e   : > { %1208 = vst [vmem:[%s2163_s11 + $0x188] sm:$0xff] %v1112_v52  ;;  %1209 = vst [vmem:[%s2163_s11 + $0x190] sm:$0xff] %v1113_v54  ;;  %v1115_v56 = vld [vmem:[#allocation2 + $0x138] sm:$0xff]  ;;  %v1116_v57 = vld [vmem:[#allocation2 + $0x140] sm:$0xff] }
 0x33f   : > { %1210 = vst [vmem:[%s2163_s11 + $0x198] sm:$0xff] %v1114_v55  ;;  %v1117_v58 = vld [vmem:[#allocation2 + $0x148] sm:$0xff]  ;;  %1211 = vst [vmem:[%s2163_s11 + $0x1a8] sm:$0xff] %v1115_v56  ;;  %v1118_v59 = vld [vmem:[#allocation2 + $0x150] sm:$0xff] }
 0x340   : > { %1212 = vst [vmem:[%s2163_s11 + $0x1b0] sm:$0xff] %v1116_v57  ;;  %1213 = vst [vmem:[%s2163_s11 + $0x1b8] sm:$0xff] %v1117_v58  ;;  %v1119_v60 = vld [vmem:[#allocation2 + $0x158] sm:$0xff]  ;;  %v1120_v61 = vld [vmem:[#allocation2 + $0x160] sm:$0xff] }
 0x341   : > { %1214 = vst [vmem:[%s2163_s11 + $0x1c8] sm:$0xff] %v1118_v59  ;;  %1215 = vst [vmem:[%s2163_s11 + $0x1d0] sm:$0xff] %v1119_v60  ;;  %v1121_v53 = vld [vmem:[#allocation2 + $0x168] sm:$0xff]  ;;  %v1122_v62 = vld [vmem:[#allocation2 + $0x170] sm:$0xff] }
 0x342   : > { %1216 = vst [vmem:[%s2163_s11 + $0x1d8] sm:$0xff] %v1120_v61  ;;  %v1123_v63 = vld [vmem:[#allocation2 + $0x178] sm:$0xff]  ;;  %1217 = vst [vmem:[%s2163_s11 + $0x1e8] sm:$0xff] %v1121_v53  ;;  %v1124_v0 = vld [vmem:[#allocation2 + $0x180] sm:$0xff] }
 0x343   : > { %1218 = vst [vmem:[%s2163_s11 + $0x1f0] sm:$0xff] %v1122_v62  ;;  %1219 = vst [vmem:[%s2163_s11 + $0x1f8] sm:$0xff] %v1123_v63  ;;  %v1125_v1 = vld [vmem:[#allocation2 + $0x188] sm:$0xff]  ;;  %v1126_v2 = vld [vmem:[#allocation2 + $0x190] sm:$0xff] }
 0x344   : > { %1220 = vst [vmem:[%s2163_s11 + $0x208] sm:$0xff] %v1124_v0  ;;  %1221 = vst [vmem:[%s2163_s11 + $0x210] sm:$0xff] %v1125_v1  ;;  %v1127_v3 = vld [vmem:[#allocation2 + $0x198] sm:$0xff]  ;;  %v1128_v4 = vld [vmem:[#allocation2 + $0x1a0] sm:$0xff] }
 0x345   : > { %1222 = vst [vmem:[%s2163_s11 + $0x218] sm:$0xff] %v1126_v2  ;;  %v1129_v5 = vld [vmem:[#allocation2 + $0x1a8] sm:$0xff]  ;;  %1223 = vst [vmem:[%s2163_s11 + $0x228] sm:$0xff] %v1127_v3  ;;  %v1130_v6 = vld [vmem:[#allocation2 + $0x1b0] sm:$0xff] }
 0x346   : > { %1224 = vst [vmem:[%s2163_s11 + $0x230] sm:$0xff] %v1128_v4  ;;  %1225 = vst [vmem:[%s2163_s11 + $0x238] sm:$0xff] %v1129_v5  ;;  %v1131_v8 = vld [vmem:[#allocation2 + $0x1b8] sm:$0xff]  ;;  %v1132_v11 = vld [vmem:[#allocation2 + $0x1c0] sm:$0xff] }
 0x347   : > { %1226 = vst [vmem:[%s2163_s11 + $0x248] sm:$0xff] %v1130_v6  ;;  %1227 = vst [vmem:[%s2163_s11 + $0x250] sm:$0xff] %v1131_v8  ;;  %v1133_v12 = vld [vmem:[#allocation2 + $0x1c8] sm:$0xff]  ;;  %v1134_v13 = vld [vmem:[#allocation2 + $0x1d0] sm:$0xff] }
 0x348   : > { %1228 = vst [vmem:[%s2163_s11 + $0x258] sm:$0xff] %v1132_v11  ;;  %v1135_v7 = vld [vmem:[#allocation2 + $0x1d8] sm:$0xff]  ;;  %1229 = vst [vmem:[%s2163_s11 + $0x268] sm:$0xff] %v1133_v12  ;;  %v1136_v14 = vld [vmem:[#allocation2 + $0x1e0] sm:$0xff] }
 0x349   : > { %1230 = vst [vmem:[%s2163_s11 + $0x270] sm:$0xff] %v1134_v13  ;;  %1231 = vst [vmem:[%s2163_s11 + $0x278] sm:$0xff] %v1135_v7  ;;  %v1137_v15 = vld [vmem:[#allocation2 + $0x1e8] sm:$0xff]  ;;  %v1138_v17 = vld [vmem:[#allocation2 + $0x1f0] sm:$0xff] }
 0x34a   : > { %1232 = vst [vmem:[%s2163_s11 + $0x288] sm:$0xff] %v1136_v14  ;;  %1233 = vst [vmem:[%s2163_s11 + $0x290] sm:$0xff] %v1137_v15  ;;  %v1139_v18 = vld [vmem:[#allocation2 + $0x1f8] sm:$0xff]  ;;  %v1140_v9 = vld [vmem:[#allocation2 + $0x200] sm:$0xff] }
 0x34b   : > { %1234 = vst [vmem:[%s2163_s11 + $0x298] sm:$0xff] %v1138_v17  ;;  %v1141_v16 = vld [vmem:[#allocation2 + $0x208] sm:$0xff]  ;;  %1235 = vst [vmem:[%s2163_s11 + $0x2a8] sm:$0xff] %v1139_v18  ;;  %v1142_v19 = vld [vmem:[#allocation2 + $0x210] sm:$0xff] }
 0x34c   : > { %1236 = vst [vmem:[%s2163_s11 + $0x2b0] sm:$0xff] %v1140_v9  ;;  %1237 = vst [vmem:[%s2163_s11 + $0x2b8] sm:$0xff] %v1141_v16  ;;  %v1143_v20 = vld [vmem:[#allocation2 + $0x218] sm:$0xff]  ;;  %v1144_v10 = vld [vmem:[#allocation2 + $0x220] sm:$0xff] }
 0x34d   : > { %1238 = vst [vmem:[%s2163_s11 + $0x2c8] sm:$0xff] %v1142_v19  ;;  %1239 = vst [vmem:[%s2163_s11 + $0x2d0] sm:$0xff] %v1143_v20  ;;  %v1145_v21 = vld [vmem:[#allocation2 + $0x228] sm:$0xff]  ;;  %v1146_v22 = vld [vmem:[#allocation2 + $0x230] sm:$0xff] }
 0x34e   : > { %1240 = vst [vmem:[%s2163_s11 + $0x2d8] sm:$0xff] %v1144_v10  ;;  %v1147_v23 = vld [vmem:[#allocation2 + $0x238] sm:$0xff]  ;;  %1241 = vst [vmem:[%s2163_s11 + $0x2e8] sm:$0xff] %v1145_v21  ;;  %v1148_v24 = vld [vmem:[#allocation2 + $0x240] sm:$0xff] }
 0x34f   : > { %1242 = vst [vmem:[%s2163_s11 + $0x2f0] sm:$0xff] %v1146_v22  ;;  %1243 = vst [vmem:[%s2163_s11 + $0x2f8] sm:$0xff] %v1147_v23  ;;  %v1149_v25 = vld [vmem:[#allocation2 + $0x248] sm:$0xff]  ;;  %v1150_v26 = vld [vmem:[#allocation2 + $0x250] sm:$0xff] }
 0x350   : > { %1244 = vst [vmem:[%s2163_s11 + $0x308] sm:$0xff] %v1148_v24  ;;  %1245 = vst [vmem:[%s2163_s11 + $0x310] sm:$0xff] %v1149_v25  ;;  %v1151_v27 = vld [vmem:[#allocation2 + $0x258] sm:$0xff]  ;;  %v1152_v28 = vld [vmem:[#allocation2 + $0x260] sm:$0xff] }
 0x351   : > { %1246 = vst [vmem:[%s2163_s11 + $0x318] sm:$0xff] %v1150_v26  ;;  %v1153_v29 = vld [vmem:[#allocation2 + $0x268] sm:$0xff]  ;;  %1247 = vst [vmem:[%s2163_s11 + $0x328] sm:$0xff] %v1151_v27  ;;  %v1154_v30 = vld [vmem:[#allocation2 + $0x270] sm:$0xff] }
 0x352   : > { %1248 = vst [vmem:[%s2163_s11 + $0x330] sm:$0xff] %v1152_v28  ;;  %1249 = vst [vmem:[%s2163_s11 + $0x338] sm:$0xff] %v1153_v29  ;;  %v1155_v31 = vld [vmem:[#allocation2 + $0x278] sm:$0xff]  ;;  %v1156_v32 = vld [vmem:[#allocation2 + $0x280] sm:$0xff] }
 0x353   : > { %1250 = vst [vmem:[%s2163_s11 + $0x348] sm:$0xff] %v1154_v30  ;;  %1251 = vst [vmem:[%s2163_s11 + $0x350] sm:$0xff] %v1155_v31  ;;  %v1157_v33 = vld [vmem:[#allocation2 + $0x288] sm:$0xff]  ;;  %v1158_v34 = vld [vmem:[#allocation2 + $0x290] sm:$0xff] }
 0x354   : > { %1252 = vst [vmem:[%s2163_s11 + $0x358] sm:$0xff] %v1156_v32  ;;  %v1159_v35 = vld [vmem:[#allocation2 + $0x298] sm:$0xff]  ;;  %1253 = vst [vmem:[%s2163_s11 + $0x368] sm:$0xff] %v1157_v33  ;;  %v1160_v36 = vld [vmem:[#allocation2 + $0x2a0] sm:$0xff] }
 0x355   : > { %1254 = vst [vmem:[%s2163_s11 + $0x370] sm:$0xff] %v1158_v34  ;;  %1255 = vst [vmem:[%s2163_s11 + $0x378] sm:$0xff] %v1159_v35  ;;  %v1161_v37 = vld [vmem:[#allocation2 + $0x2a8] sm:$0xff]  ;;  %v1162_v38 = vld [vmem:[#allocation2 + $0x2b0] sm:$0xff] }
 0x356   : > { %1256 = vst [vmem:[%s2163_s11 + $0x388] sm:$0xff] %v1160_v36  ;;  %1257 = vst [vmem:[%s2163_s11 + $0x390] sm:$0xff] %v1161_v37  ;;  %v1163_v39 = vld [vmem:[#allocation2 + $0x2b8] sm:$0xff]  ;;  %v1164_v40 = vld [vmem:[#allocation2 + $0x2c0] sm:$0xff] }
 0x357   : > { %1258 = vst [vmem:[%s2163_s11 + $0x398] sm:$0xff] %v1162_v38  ;;  %v1165_v41 = vld [vmem:[#allocation2 + $0x2c8] sm:$0xff]  ;;  %1259 = vst [vmem:[%s2163_s11 + $0x3a8] sm:$0xff] %v1163_v39  ;;  %v1166_v42 = vld [vmem:[#allocation2 + $0x2d0] sm:$0xff] }
 0x358   : > { %1260 = vst [vmem:[%s2163_s11 + $0x3b0] sm:$0xff] %v1164_v40  ;;  %1261 = vst [vmem:[%s2163_s11 + $0x3b8] sm:$0xff] %v1165_v41  ;;  %v1167_v43 = vld [vmem:[#allocation2 + $0x2d8] sm:$0xff]  ;;  %v1168_v44 = vld [vmem:[#allocation2 + $0x2e0] sm:$0xff] }
 0x359   : > { %1262 = vst [vmem:[%s2163_s11 + $0x3c8] sm:$0xff] %v1166_v42  ;;  %1263 = vst [vmem:[%s2163_s11 + $0x3d0] sm:$0xff] %v1167_v43  ;;  %v1169_v45 = vld [vmem:[#allocation2 + $0x2e8] sm:$0xff]  ;;  %v1170_v46 = vld [vmem:[#allocation2 + $0x2f0] sm:$0xff] }
 0x35a   : > { %1264 = vst [vmem:[%s2163_s11 + $0x3d8] sm:$0xff] %v1168_v44  ;;  %v1171_v47 = vld [vmem:[#allocation2 + $0x2f8] sm:$0xff]  ;;  %1265 = vst [vmem:[%s2163_s11 + $0x3e8] sm:$0xff] %v1169_v45 }
 0x35b   : > { %1266 = vst [vmem:[%s2163_s11 + $0x3f0] sm:$0xff] %v1170_v46  ;;  %1267 = vst [vmem:[%s2163_s11 + $0x3f8] sm:$0xff] %v1171_v47 }
 0x35c   : > { %1821 = shalt.err (!%p1818_p8)
}
 0x35d   : > { %s1822_s11 = scalar_lea.hbm %s2566_s21, 16384  ;;  %s1826_s4 = scalar_lea.hbm %s2628_s7, 32768 }
 0x35e   : > { %p1823_p10 = scmp.ne.s32.totalorder %s2566_s21, %s1822_s11  ;;  %p1827_p7 = scmp.lt.u32.totalorder %s2566_s21, %s2628_s7 }
 0x35f   : > { %p1828_p4 = scmp.lt.u32.totalorder %s1826_s4, %s1822_s11  ;;  %p1830_p1 = scmp.lt.u32.totalorder %s1822_s11, %s2566_s21 }
 0x360   : > { %p1824_p0 = pnand %p1823_p10, %p2659_p9 }
 0x361   : > { %p1829_p11 = por %p1828_p4, %p1827_p7 }
 0x362   : > { %p1825_p3 = pneg %p1824_p0 }
 0x363   : > { %p1831_p12 = por %p1830_p1, %p1829_p11 }
 0x365   : > { %p1832_p13 = pnand %p1831_p12, %p1825_p3 }
 0x367   : > { %1835 = shalt.err (!%p1832_p13)
}
 0x368   : > { %s1912_s17 = smov 512   ;;  %s1913_s27 = smov 32  }
 0x369   : > { %1558 = dma.vmem_to_hbm [thread:$0]  (%p2659_p9), %s2568_s16, 16384, %s2566_s21, %s1269_s12, %s1912_s17, %s1912_s17, %s1913_s27  }
 0x36a PF: > { %s2660_s18 = sld [smem:[#allocation28_spill]]  ;;  %s1298_s10 = sand.u32 1, %s1878_s14  }
 0x36b   : > { %p2661_p2 = scmp.ne.s32.totalorder %s2644_s20, 0  ;;  %s1299_s28 = scalar_lea.sflag [#allocation8], %s1298_s10 }
 0x370   : > { %p2662_p5 = scmp.ge.s32.totalorder %s2660_s18, 2 }
 0x372   : > { %p1572_p6 = pnand %p2662_p5, %p2661_p2 }
 0x374   : > { %1873 = dma.done.wait (!%p1572_p6), %s1299_s28, 16384  }
 0x375   : > { %1875 = vsyncadd (!%p1572_p6), %s1299_s28, 4294950912  ;;  %s2663_s17 = sld [smem:[#allocation29_spill]]  ;;  %s2664_s14 = sld [smem:[#allocation26_spill]] }
 0x376   : > { %s2665_s15 = sld [smem:[#allocation27_spill]]  ;;  %s2666_s16 = sld [smem:[#allocation30_spill]] }
 0x37b   : > { %p25_p8 = scmp.ge.s32.totalorder %s2663_s17, 4  }
 0x37d   :  { %27 = sbr.rel (!%p25_p8) target bundleno = 22 (0x16), region = 147 }
 0x384   :  { %1304 = vsyncpa [#allocation7], 1 }
 0x385   :  { %1306 = vsyncpa [#allocation7 + $0x1], 1 }
 0x386   :  { %1307 = vsyncpa [#allocation10], 1 }
 0x387   :  { %1308 = vsyncpa [#allocation8], 1 }
 0x388   :  { %1310 = vsyncpa [#allocation8 + $0x1], 1 }
 0x389   :  { %1311 = vsyncmov [#allocation3] }
 0x38c   :  { %s1312_s20 = vpop.sfrf %1311 }
 0x38d   :  { %p1432_p9 = scmp.ne.s32.totalorder %s1312_s20, 0 }
 0x38f   :  { %1316 = shalt.err (%p1432_p9)  }

</bundles_post_ra>
